<compile_context>
chip_gen: v6e
topology: v6e:2x2x1
jax: 0.10.0
libtpu: 0.0.40
codegen_flags: <defaults>
</compile_context>

<pallas_src>
import functools

import numpy as np
import jax
import jax.numpy as jnp
from jax.experimental import pallas as pl
from jax.experimental.pallas import tpu as pltpu

# ---- synthetic Config (fields used by the PyTorch module) ----
NUM_CHANNELS = 4   # config.numChannels  (C)
KERNEL_SIZE  = 3   # config.kernelSize   (kz)
NUM_LAYERS   = 3   # config.numLayers    (L)
PAD          = KERNEL_SIZE // 2
STRIDE       = 2
BN_EPS       = 1e-5


# ---------------------------------------------------------------------------
# Host-side constants: im2col-as-matmul gather matrices (0/1, exact in bf16)
# ---------------------------------------------------------------------------
def _build_gather_matrix(h, w, ho, wo):
    """G[k, y*w+x, oy*wo+ox] = 1 iff input pixel (y,x) is tap k of output (oy,ox).

    Zero-padding of the conv is encoded implicitly: out-of-bounds taps simply
    have no 1 in their column, so they contribute 0.
    """
    kz, s, p = KERNEL_SIZE, STRIDE, PAD
    g = np.zeros((kz * kz, h * w, ho * wo), np.float32)
    for dy in range(kz):
        for dx in range(kz):
            k = dy * kz + dx
            for oy in range(ho):
                yy = s * oy + dy - p
                if not 0 <= yy < h:
                    continue
                for ox in range(wo):
                    xx = s * ox + dx - p
                    if 0 <= xx < w:
                        g[k, yy * w + xx, oy * wo + ox] = 1.0
    return g


# ---------------------------------------------------------------------------
# Pallas kernel: the whole encoder fused in a single call.
#   activations a: (N*C_in, H*W) f32   (rows n-major/c-minor, lanes spatial)
#   per layer l:
#     wb_l: (kz*kz, N*C_out, N*C_in)   block-diag-over-batch conv taps (bf16)
#     g_l : (kz*kz, H*W, Ho*Wo)        0/1 gather matrices            (bf16)
#   gb  : (N*C, 2L)  BN gamma/beta columns, tiled over batch rows     (f32)
#   m   : (N*C, N*C) 0/1 "same channel" matrix -> one matmul both sums BN
#         statistics over the batch and broadcasts them back          (f32)
# ---------------------------------------------------------------------------
def _encoder_kernel(x_ref, gb_ref, m_ref, *rest, batch, eps):
    o_ref = rest[-1]
    layer_refs = rest[:-1]
    num_layers = len(layer_refs) // 2

    m = m_ref[...]                      # (N*C, N*C) f32
    a = x_ref[...]                      # (N*C_in, H*W) f32

    for l in range(num_layers):
        wb_ref = layer_refs[2 * l]      # (kz*kz, N*C_out, N*C_in) bf16
        g_ref = layer_refs[2 * l + 1]   # (kz*kz, H*W, Ho*Wo)      bf16
        kk = g_ref.shape[0]
        q = g_ref.shape[2]
        rows_out = wb_ref.shape[1]

        # ---- Conv2d(stride=2, pad=kz//2), bias dropped (no-op under BN) ----
        a_bf = a.astype(jnp.bfloat16)
        y = jnp.zeros((rows_out, q), jnp.float32)
        for k in range(kk):
            # gather tap k of every output pixel (exact 0/1 selection on MXU)
            patches = jnp.dot(a_bf, g_ref[k],
                              preferred_element_type=jnp.float32)
            # block-diagonal (over batch) channel contraction; f32 accumulate
            y = y + jnp.dot(wb_ref[k], patches.astype(jnp.bfloat16),
                            preferred_element_type=jnp.float32)

        # ---- BatchNorm2d (training mode: batch statistics over N,Ho,Wo) ----
        inv_cnt = 1.0 / float(batch * q)
        row_sum = jnp.sum(y, axis=-1, keepdims=True)                 # lane reduce
        mean_b = jnp.dot(m, row_sum,
                         preferred_element_type=jnp.float32) * inv_cnt
        yc = y - mean_b
        sq_sum = jnp.sum(yc * yc, axis=-1, keepdims=True)
        var_b = jnp.dot(m, sq_sum,
                        preferred_element_type=jnp.float32) * inv_cnt
        gamma_b = gb_ref[:, 2 * l:2 * l + 1]                         # (N*C, 1)
        beta_b = gb_ref[:, 2 * l + 1:2 * l + 2]                      # (N*C, 1)
        y = yc * (gamma_b * jax.lax.rsqrt(var_b + eps)) + beta_b

        if l < num_layers - 1:
            y = jnp.maximum(y, 0.0)              # ReLU (all but last block)
        else:
            y = jnp.where(y < 0.0, -1.0, 1.0)    # Binarize_bp.forward (sign)
        a = y

    o_ref[...] = a.astype(o_ref.dtype)


def _full_spec(shape):
    shape = tuple(shape)

    def _zero_index_map(i):
        return (0,) * len(shape)

    return pl.BlockSpec(shape, _zero_index_map)


# ---------------------------------------------------------------------------
# Builder: precomputes static geometry/constants and returns a jitted forward.
# ---------------------------------------------------------------------------
def make_encoder(batch, in_channel, height, width):
    del in_channel  # geometry only depends on spatial dims
    gathers = []
    h, w = height, width
    for _ in range(NUM_LAYERS):
        ho = (h + 2 * PAD - KERNEL_SIZE) // STRIDE + 1
        wo = (w + 2 * PAD - KERNEL_SIZE) // STRIDE + 1
        gathers.append(jnp.asarray(_build_gather_matrix(h, w, ho, wo),
                                   jnp.bfloat16))
        h, w = ho, wo
    ho_f, wo_f = h, w

    # M[r, r'] = 1 iff rows r, r' refer to the same channel (across batch).
    m_mat = jnp.asarray(
        np.kron(np.ones((batch, batch), np.float32),
                np.eye(NUM_CHANNELS, dtype=np.float32)),
        jnp.float32)

    kernel = functools.partial(_encoder_kernel, batch=batch, eps=BN_EPS)

    @jax.jit
    def forward(x, params):
        n, cin, hh, ww = x.shape
        # NCHW -> (N*C_in, H*W): pure reshape (rows n-major/c-minor, lanes spatial).
        a0 = x.reshape(n * cin, hh * ww).astype(jnp.float32)

        eye_n = jnp.eye(n, dtype=jnp.float32)
        wbs, gb_cols = [], []
        for (wgt, gamma, beta) in params:
            cout, cin_l, kz, _ = wgt.shape
            wk = wgt.transpose(2, 3, 0, 1).reshape(kz * kz, cout, cin_l)
            # Block-diagonal (over batch) per-tap weight: kron(I_N, W_tap).
            wb = jnp.einsum('ab,kij->kaibj', eye_n, wk).reshape(
                kz * kz, n * cout, n * cin_l)
            wbs.append(wb.astype(jnp.bfloat16))
            gb_cols.extend([gamma, beta])
        # All BN affine params packed into ONE (N*C, 2L) array.
        gb = jnp.tile(jnp.stack(gb_cols, axis=1).astype(jnp.float32), (n, 1))

        inputs = [a0, gb, m_mat]
        in_specs = [_full_spec(a0.shape), _full_spec(gb.shape),
                    _full_spec(m_mat.shape)]
        for wb, g in zip(wbs, gathers):
            inputs += [wb, g]
            in_specs += [_full_spec(wb.shape), _full_spec(g.shape)]

        out_rows = n * NUM_CHANNELS
        out_cols = ho_f * wo_f
        out2 = pl.pallas_call(
            kernel,
            out_shape=jax.ShapeDtypeStruct((out_rows, out_cols), jnp.float32),
            grid=(1,),
            in_specs=in_specs,
            out_specs=_full_spec((out_rows, out_cols)),
            compiler_params=pltpu.CompilerParams(
                dimension_semantics=("arbitrary",)),
        )(*inputs)
        # (N*C, Ho*Wo) -> NCHW: pure reshape (row order already n-major, c-minor).
        return out2.reshape(n, NUM_CHANNELS, ho_f, wo_f)

    return forward


# ---------------------------------------------------------------------------
# Parameters + pure-JAX reference (for a sign-agreement check)
# ---------------------------------------------------------------------------
def init_params(key, in_channel):
    """Conv weights (PyTorch-style uniform) + BN affine params.

    The conv bias is omitted on purpose: under training-mode BatchNorm the
    per-channel mean subtraction cancels it exactly, so dropping it is a
    mathematical no-op (and saves a broadcast-add + one input DMA).
    """
    params = []
    cin = in_channel
    for _ in range(NUM_LAYERS):
        key, k_w, k_g, k_b = jax.random.split(key, 4)
        fan_in = cin * KERNEL_SIZE * KERNEL_SIZE
        bound = 1.0 / (fan_in ** 0.5)
        w = jax.random.uniform(
            k_w, (NUM_CHANNELS, cin, KERNEL_SIZE, KERNEL_SIZE),
            jnp.float32, -bound, bound)
        gamma = jax.random.uniform(k_g, (NUM_CHANNELS,), jnp.float32, 0.8, 1.2)
        beta = 0.1 * jax.random.normal(k_b, (NUM_CHANNELS,), jnp.float32)
        params.append((w, gamma, beta))
        cin = NUM_CHANNELS
    return params


def reference_pre_binarize(x, params):
    """Pure-JAX/XLA reference: conv -> train-mode BN -> ReLU, pre-binarization."""
    a = x
    for l, (w, gamma, beta) in enumerate(params):
        y = jax.lax.conv_general_dilated(
            a, w, window_strides=(STRIDE, STRIDE),
            padding=((PAD, PAD), (PAD, PAD)),
            dimension_numbers=('NCHW', 'OIHW', 'NCHW'))
        mean = jnp.mean(y, axis=(0, 2, 3), keepdims=True)
        var = jnp.mean((y - mean) ** 2, axis=(0, 2, 3), keepdims=True)
        y = (y - mean) * jax.lax.rsqrt(var + BN_EPS)
        y = y * gamma.reshape(1, -1, 1, 1) + beta.reshape(1, -1, 1, 1)
        if l < len(params) - 1:
            y = jnp.maximum(y, 0.0)
        a = y
    return a


if __name__ == "__main__":
    key = jax.random.PRNGKey(0)
    key, k_x, k_p = jax.random.split(key, 3)

    N, CIN, H, W = 2, 3, 16, 16
    x = jax.random.normal(k_x, (N, CIN, H, W), jnp.float32)   # NCHW, like PyTorch
    params = init_params(k_p, in_channel=CIN)

    forward = make_encoder(N, CIN, H, W)
    out = jax.block_until_ready(forward(x, params))

    # Shape & binarization sanity (spatial halved L times; values in {-1, +1}).
    assert out.shape == (N, NUM_CHANNELS,
                         H // (2 ** NUM_LAYERS), W // (2 ** NUM_LAYERS))
    assert bool(jnp.all(jnp.abs(out) == 1.0))

    # Numerical check vs. pure-JAX reference.  bf16 MXU inputs can legitimately
    # flip the sign of values sitting right at the binarization boundary, so
    # compare only where the reference is comfortably away from zero.
    pre = reference_pre_binarize(x, params)
    ref = jnp.where(pre < 0.0, -1.0, 1.0)
    safe = jnp.abs(pre) > 0.2
    assert bool(jnp.all(jnp.where(safe, out == ref, True)))

    print("KERNEL_OK")
</pallas_src>

<mosaic_0001>
module attributes {stable_mosaic.version = 11 : i64} {
  func.func @_encoder_kernel(%arg0: i32, %arg1: memref<6x256xf32, #tpu.memory_space<vmem>>, %arg2: memref<8x6xf32, #tpu.memory_space<vmem>>, %arg3: memref<8x8xf32, #tpu.memory_space<vmem>>, %arg4: memref<9x8x6xbf16, #tpu.memory_space<vmem>>, %arg5: memref<9x256x64xbf16, #tpu.memory_space<vmem>>, %arg6: memref<9x8x8xbf16, #tpu.memory_space<vmem>>, %arg7: memref<9x64x16xbf16, #tpu.memory_space<vmem>>, %arg8: memref<9x8x8xbf16, #tpu.memory_space<vmem>>, %arg9: memref<9x16x4xbf16, #tpu.memory_space<vmem>>, %arg10: memref<8x4xf32, #tpu.memory_space<vmem>>) attributes {dimension_semantics = [#tpu.dimension_semantics<arbitrary>], iteration_bounds = array<i64: 1>, scalar_prefetch = 0 : i64, scratch_operands = 0 : i64, tpu.core_type = #tpu.core_type<tc>, window_params = [{pipeline_mode = #tpu.pipeline_mode<synchronous>, transform_indices = @transform_0, window_bounds = array<i64: 6, 256>}, {pipeline_mode = #tpu.pipeline_mode<synchronous>, transform_indices = @transform_1, window_bounds = array<i64: 8, 6>}, {pipeline_mode = #tpu.pipeline_mode<synchronous>, transform_indices = @transform_2, window_bounds = array<i64: 8, 8>}, {pipeline_mode = #tpu.pipeline_mode<synchronous>, transform_indices = @transform_3, window_bounds = array<i64: 9, 8, 6>}, {pipeline_mode = #tpu.pipeline_mode<synchronous>, transform_indices = @transform_4, window_bounds = array<i64: 9, 256, 64>}, {pipeline_mode = #tpu.pipeline_mode<synchronous>, transform_indices = @transform_5, window_bounds = array<i64: 9, 8, 8>}, {pipeline_mode = #tpu.pipeline_mode<synchronous>, transform_indices = @transform_6, window_bounds = array<i64: 9, 64, 16>}, {pipeline_mode = #tpu.pipeline_mode<synchronous>, transform_indices = @transform_7, window_bounds = array<i64: 9, 8, 8>}, {pipeline_mode = #tpu.pipeline_mode<synchronous>, transform_indices = @transform_8, window_bounds = array<i64: 9, 16, 4>}, {pipeline_mode = #tpu.pipeline_mode<synchronous>, transform_indices = @transform_9, window_bounds = array<i64: 8, 4>}]} {
    %c0 = arith.constant 0 : index
    %c0_0 = arith.constant 0 : index
    %0 = vector.load %arg3[%c0, %c0_0] : memref<8x8xf32, #tpu.memory_space<vmem>>, vector<8x8xf32>
    %c0_1 = arith.constant 0 : index
    %c0_2 = arith.constant 0 : index
    %1 = vector.load %arg1[%c0_1, %c0_2] : memref<6x256xf32, #tpu.memory_space<vmem>>, vector<6x256xf32>
    %2 = arith.truncf %1 : vector<6x256xf32> to vector<6x256xbf16>
    %cst = arith.constant 0.000000e+00 : f32
    %3 = vector.broadcast %cst : f32 to vector<8x64xf32>
    %c0_3 = arith.constant 0 : index
    %c0_4 = arith.constant 0 : index
    %c0_5 = arith.constant 0 : index
    %4 = vector.load %arg5[%c0_3, %c0_4, %c0_5] : memref<9x256x64xbf16, #tpu.memory_space<vmem>>, vector<1x256x64xbf16>
    %5 = vector.shape_cast %4 : vector<1x256x64xbf16> to vector<256x64xbf16>
    %cst_6 = arith.constant dense<0.000000e+00> : vector<6x64xf32>
    %6 = tpu.matmul %2, %5, %cst_6 {dimension_numbers = #tpu.dot_dimension_numbers<[1], [0], [0], [1], [0, 0, 1, 1], [], []>} : vector<6x256xbf16>, vector<256x64xbf16>, vector<6x64xf32> -> vector<6x64xf32>
    %c0_7 = arith.constant 0 : index
    %c0_8 = arith.constant 0 : index
    %c0_9 = arith.constant 0 : index
    %7 = vector.load %arg4[%c0_7, %c0_8, %c0_9] : memref<9x8x6xbf16, #tpu.memory_space<vmem>>, vector<1x8x6xbf16>
    %8 = vector.shape_cast %7 : vector<1x8x6xbf16> to vector<8x6xbf16>
    %9 = arith.truncf %6 : vector<6x64xf32> to vector<6x64xbf16>
    %cst_10 = arith.constant dense<0.000000e+00> : vector<8x64xf32>
    %10 = tpu.matmul %8, %9, %cst_10 {dimension_numbers = #tpu.dot_dimension_numbers<[1], [0], [0], [1], [0, 0, 1, 1], [], []>} : vector<8x6xbf16>, vector<6x64xbf16>, vector<8x64xf32> -> vector<8x64xf32>
    %11 = arith.addf %3, %10 : vector<8x64xf32>
    %c1 = arith.constant 1 : index
    %c0_11 = arith.constant 0 : index
    %c0_12 = arith.constant 0 : index
    %12 = vector.load %arg5[%c1, %c0_11, %c0_12] : memref<9x256x64xbf16, #tpu.memory_space<vmem>>, vector<1x256x64xbf16>
    %13 = vector.shape_cast %12 : vector<1x256x64xbf16> to vector<256x64xbf16>
    %cst_13 = arith.constant dense<0.000000e+00> : vector<6x64xf32>
    %14 = tpu.matmul %2, %13, %cst_13 {dimension_numbers = #tpu.dot_dimension_numbers<[1], [0], [0], [1], [0, 0, 1, 1], [], []>} : vector<6x256xbf16>, vector<256x64xbf16>, vector<6x64xf32> -> vector<6x64xf32>
    %c1_14 = arith.constant 1 : index
    %c0_15 = arith.constant 0 : index
    %c0_16 = arith.constant 0 : index
    %15 = vector.load %arg4[%c1_14, %c0_15, %c0_16] : memref<9x8x6xbf16, #tpu.memory_space<vmem>>, vector<1x8x6xbf16>
    %16 = vector.shape_cast %15 : vector<1x8x6xbf16> to vector<8x6xbf16>
    %17 = arith.truncf %14 : vector<6x64xf32> to vector<6x64xbf16>
    %cst_17 = arith.constant dense<0.000000e+00> : vector<8x64xf32>
    %18 = tpu.matmul %16, %17, %cst_17 {dimension_numbers = #tpu.dot_dimension_numbers<[1], [0], [0], [1], [0, 0, 1, 1], [], []>} : vector<8x6xbf16>, vector<6x64xbf16>, vector<8x64xf32> -> vector<8x64xf32>
    %19 = arith.addf %11, %18 : vector<8x64xf32>
    %c2 = arith.constant 2 : index
    %c0_18 = arith.constant 0 : index
    %c0_19 = arith.constant 0 : index
    %20 = vector.load %arg5[%c2, %c0_18, %c0_19] : memref<9x256x64xbf16, #tpu.memory_space<vmem>>, vector<1x256x64xbf16>
    %21 = vector.shape_cast %20 : vector<1x256x64xbf16> to vector<256x64xbf16>
    %cst_20 = arith.constant dense<0.000000e+00> : vector<6x64xf32>
    %22 = tpu.matmul %2, %21, %cst_20 {dimension_numbers = #tpu.dot_dimension_numbers<[1], [0], [0], [1], [0, 0, 1, 1], [], []>} : vector<6x256xbf16>, vector<256x64xbf16>, vector<6x64xf32> -> vector<6x64xf32>
    %c2_21 = arith.constant 2 : index
    %c0_22 = arith.constant 0 : index
    %c0_23 = arith.constant 0 : index
    %23 = vector.load %arg4[%c2_21, %c0_22, %c0_23] : memref<9x8x6xbf16, #tpu.memory_space<vmem>>, vector<1x8x6xbf16>
    %24 = vector.shape_cast %23 : vector<1x8x6xbf16> to vector<8x6xbf16>
    %25 = arith.truncf %22 : vector<6x64xf32> to vector<6x64xbf16>
    %cst_24 = arith.constant dense<0.000000e+00> : vector<8x64xf32>
    %26 = tpu.matmul %24, %25, %cst_24 {dimension_numbers = #tpu.dot_dimension_numbers<[1], [0], [0], [1], [0, 0, 1, 1], [], []>} : vector<8x6xbf16>, vector<6x64xbf16>, vector<8x64xf32> -> vector<8x64xf32>
    %27 = arith.addf %19, %26 : vector<8x64xf32>
    %c3 = arith.constant 3 : index
    %c0_25 = arith.constant 0 : index
    %c0_26 = arith.constant 0 : index
    %28 = vector.load %arg5[%c3, %c0_25, %c0_26] : memref<9x256x64xbf16, #tpu.memory_space<vmem>>, vector<1x256x64xbf16>
    %29 = vector.shape_cast %28 : vector<1x256x64xbf16> to vector<256x64xbf16>
    %cst_27 = arith.constant dense<0.000000e+00> : vector<6x64xf32>
    %30 = tpu.matmul %2, %29, %cst_27 {dimension_numbers = #tpu.dot_dimension_numbers<[1], [0], [0], [1], [0, 0, 1, 1], [], []>} : vector<6x256xbf16>, vector<256x64xbf16>, vector<6x64xf32> -> vector<6x64xf32>
    %c3_28 = arith.constant 3 : index
    %c0_29 = arith.constant 0 : index
    %c0_30 = arith.constant 0 : index
    %31 = vector.load %arg4[%c3_28, %c0_29, %c0_30] : memref<9x8x6xbf16, #tpu.memory_space<vmem>>, vector<1x8x6xbf16>
    %32 = vector.shape_cast %31 : vector<1x8x6xbf16> to vector<8x6xbf16>
    %33 = arith.truncf %30 : vector<6x64xf32> to vector<6x64xbf16>
    %cst_31 = arith.constant dense<0.000000e+00> : vector<8x64xf32>
    %34 = tpu.matmul %32, %33, %cst_31 {dimension_numbers = #tpu.dot_dimension_numbers<[1], [0], [0], [1], [0, 0, 1, 1], [], []>} : vector<8x6xbf16>, vector<6x64xbf16>, vector<8x64xf32> -> vector<8x64xf32>
    %35 = arith.addf %27, %34 : vector<8x64xf32>
    %c4 = arith.constant 4 : index
    %c0_32 = arith.constant 0 : index
    %c0_33 = arith.constant 0 : index
    %36 = vector.load %arg5[%c4, %c0_32, %c0_33] : memref<9x256x64xbf16, #tpu.memory_space<vmem>>, vector<1x256x64xbf16>
    %37 = vector.shape_cast %36 : vector<1x256x64xbf16> to vector<256x64xbf16>
    %cst_34 = arith.constant dense<0.000000e+00> : vector<6x64xf32>
    %38 = tpu.matmul %2, %37, %cst_34 {dimension_numbers = #tpu.dot_dimension_numbers<[1], [0], [0], [1], [0, 0, 1, 1], [], []>} : vector<6x256xbf16>, vector<256x64xbf16>, vector<6x64xf32> -> vector<6x64xf32>
    %c4_35 = arith.constant 4 : index
    %c0_36 = arith.constant 0 : index
    %c0_37 = arith.constant 0 : index
    %39 = vector.load %arg4[%c4_35, %c0_36, %c0_37] : memref<9x8x6xbf16, #tpu.memory_space<vmem>>, vector<1x8x6xbf16>
    %40 = vector.shape_cast %39 : vector<1x8x6xbf16> to vector<8x6xbf16>
    %41 = arith.truncf %38 : vector<6x64xf32> to vector<6x64xbf16>
    %cst_38 = arith.constant dense<0.000000e+00> : vector<8x64xf32>
    %42 = tpu.matmul %40, %41, %cst_38 {dimension_numbers = #tpu.dot_dimension_numbers<[1], [0], [0], [1], [0, 0, 1, 1], [], []>} : vector<8x6xbf16>, vector<6x64xbf16>, vector<8x64xf32> -> vector<8x64xf32>
    %43 = arith.addf %35, %42 : vector<8x64xf32>
    %c5 = arith.constant 5 : index
    %c0_39 = arith.constant 0 : index
    %c0_40 = arith.constant 0 : index
    %44 = vector.load %arg5[%c5, %c0_39, %c0_40] : memref<9x256x64xbf16, #tpu.memory_space<vmem>>, vector<1x256x64xbf16>
    %45 = vector.shape_cast %44 : vector<1x256x64xbf16> to vector<256x64xbf16>
    %cst_41 = arith.constant dense<0.000000e+00> : vector<6x64xf32>
    %46 = tpu.matmul %2, %45, %cst_41 {dimension_numbers = #tpu.dot_dimension_numbers<[1], [0], [0], [1], [0, 0, 1, 1], [], []>} : vector<6x256xbf16>, vector<256x64xbf16>, vector<6x64xf32> -> vector<6x64xf32>
    %c5_42 = arith.constant 5 : index
    %c0_43 = arith.constant 0 : index
    %c0_44 = arith.constant 0 : index
    %47 = vector.load %arg4[%c5_42, %c0_43, %c0_44] : memref<9x8x6xbf16, #tpu.memory_space<vmem>>, vector<1x8x6xbf16>
    %48 = vector.shape_cast %47 : vector<1x8x6xbf16> to vector<8x6xbf16>
    %49 = arith.truncf %46 : vector<6x64xf32> to vector<6x64xbf16>
    %cst_45 = arith.constant dense<0.000000e+00> : vector<8x64xf32>
    %50 = tpu.matmul %48, %49, %cst_45 {dimension_numbers = #tpu.dot_dimension_numbers<[1], [0], [0], [1], [0, 0, 1, 1], [], []>} : vector<8x6xbf16>, vector<6x64xbf16>, vector<8x64xf32> -> vector<8x64xf32>
    %51 = arith.addf %43, %50 : vector<8x64xf32>
    %c6 = arith.constant 6 : index
    %c0_46 = arith.constant 0 : index
    %c0_47 = arith.constant 0 : index
    %52 = vector.load %arg5[%c6, %c0_46, %c0_47] : memref<9x256x64xbf16, #tpu.memory_space<vmem>>, vector<1x256x64xbf16>
    %53 = vector.shape_cast %52 : vector<1x256x64xbf16> to vector<256x64xbf16>
    %cst_48 = arith.constant dense<0.000000e+00> : vector<6x64xf32>
    %54 = tpu.matmul %2, %53, %cst_48 {dimension_numbers = #tpu.dot_dimension_numbers<[1], [0], [0], [1], [0, 0, 1, 1], [], []>} : vector<6x256xbf16>, vector<256x64xbf16>, vector<6x64xf32> -> vector<6x64xf32>
    %c6_49 = arith.constant 6 : index
    %c0_50 = arith.constant 0 : index
    %c0_51 = arith.constant 0 : index
    %55 = vector.load %arg4[%c6_49, %c0_50, %c0_51] : memref<9x8x6xbf16, #tpu.memory_space<vmem>>, vector<1x8x6xbf16>
    %56 = vector.shape_cast %55 : vector<1x8x6xbf16> to vector<8x6xbf16>
    %57 = arith.truncf %54 : vector<6x64xf32> to vector<6x64xbf16>
    %cst_52 = arith.constant dense<0.000000e+00> : vector<8x64xf32>
    %58 = tpu.matmul %56, %57, %cst_52 {dimension_numbers = #tpu.dot_dimension_numbers<[1], [0], [0], [1], [0, 0, 1, 1], [], []>} : vector<8x6xbf16>, vector<6x64xbf16>, vector<8x64xf32> -> vector<8x64xf32>
    %59 = arith.addf %51, %58 : vector<8x64xf32>
    %c7 = arith.constant 7 : index
    %c0_53 = arith.constant 0 : index
    %c0_54 = arith.constant 0 : index
    %60 = vector.load %arg5[%c7, %c0_53, %c0_54] : memref<9x256x64xbf16, #tpu.memory_space<vmem>>, vector<1x256x64xbf16>
    %61 = vector.shape_cast %60 : vector<1x256x64xbf16> to vector<256x64xbf16>
    %cst_55 = arith.constant dense<0.000000e+00> : vector<6x64xf32>
    %62 = tpu.matmul %2, %61, %cst_55 {dimension_numbers = #tpu.dot_dimension_numbers<[1], [0], [0], [1], [0, 0, 1, 1], [], []>} : vector<6x256xbf16>, vector<256x64xbf16>, vector<6x64xf32> -> vector<6x64xf32>
    %c7_56 = arith.constant 7 : index
    %c0_57 = arith.constant 0 : index
    %c0_58 = arith.constant 0 : index
    %63 = vector.load %arg4[%c7_56, %c0_57, %c0_58] : memref<9x8x6xbf16, #tpu.memory_space<vmem>>, vector<1x8x6xbf16>
    %64 = vector.shape_cast %63 : vector<1x8x6xbf16> to vector<8x6xbf16>
    %65 = arith.truncf %62 : vector<6x64xf32> to vector<6x64xbf16>
    %cst_59 = arith.constant dense<0.000000e+00> : vector<8x64xf32>
    %66 = tpu.matmul %64, %65, %cst_59 {dimension_numbers = #tpu.dot_dimension_numbers<[1], [0], [0], [1], [0, 0, 1, 1], [], []>} : vector<8x6xbf16>, vector<6x64xbf16>, vector<8x64xf32> -> vector<8x64xf32>
    %67 = arith.addf %59, %66 : vector<8x64xf32>
    %c8 = arith.constant 8 : index
    %c0_60 = arith.constant 0 : index
    %c0_61 = arith.constant 0 : index
    %68 = vector.load %arg5[%c8, %c0_60, %c0_61] : memref<9x256x64xbf16, #tpu.memory_space<vmem>>, vector<1x256x64xbf16>
    %69 = vector.shape_cast %68 : vector<1x256x64xbf16> to vector<256x64xbf16>
    %cst_62 = arith.constant dense<0.000000e+00> : vector<6x64xf32>
    %70 = tpu.matmul %2, %69, %cst_62 {dimension_numbers = #tpu.dot_dimension_numbers<[1], [0], [0], [1], [0, 0, 1, 1], [], []>} : vector<6x256xbf16>, vector<256x64xbf16>, vector<6x64xf32> -> vector<6x64xf32>
    %c8_63 = arith.constant 8 : index
    %c0_64 = arith.constant 0 : index
    %c0_65 = arith.constant 0 : index
    %71 = vector.load %arg4[%c8_63, %c0_64, %c0_65] : memref<9x8x6xbf16, #tpu.memory_space<vmem>>, vector<1x8x6xbf16>
    %72 = vector.shape_cast %71 : vector<1x8x6xbf16> to vector<8x6xbf16>
    %73 = arith.truncf %70 : vector<6x64xf32> to vector<6x64xbf16>
    %cst_66 = arith.constant dense<0.000000e+00> : vector<8x64xf32>
    %74 = tpu.matmul %72, %73, %cst_66 {dimension_numbers = #tpu.dot_dimension_numbers<[1], [0], [0], [1], [0, 0, 1, 1], [], []>} : vector<8x6xbf16>, vector<6x64xbf16>, vector<8x64xf32> -> vector<8x64xf32>
    %75 = arith.addf %67, %74 : vector<8x64xf32>
    %cst_67 = arith.constant dense<0.000000e+00> : vector<8xf32>
    %76 = vector.multi_reduction <add>, %75, %cst_67 [1] : vector<8x64xf32> to vector<8xf32>
    %77 = vector.shape_cast %76 : vector<8xf32> to vector<8x1xf32>
    %cst_68 = arith.constant dense<0.000000e+00> : vector<8x1xf32>
    %78 = tpu.matmul %0, %77, %cst_68 {dimension_numbers = #tpu.dot_dimension_numbers<[1], [0], [0], [1], [0, 0, 1, 1], [], []>} : vector<8x8xf32>, vector<8x1xf32>, vector<8x1xf32> -> vector<8x1xf32>
    %cst_69 = arith.constant 7.812500e-03 : f32
    %79 = vector.broadcast %cst_69 : f32 to vector<8x1xf32>
    %80 = arith.mulf %78, %79 : vector<8x1xf32>
    %81 = vector.broadcast %80 : vector<8x1xf32> to vector<8x64xf32>
    %82 = arith.subf %75, %81 : vector<8x64xf32>
    %83 = arith.mulf %82, %82 : vector<8x64xf32>
    %cst_70 = arith.constant dense<0.000000e+00> : vector<8xf32>
    %84 = vector.multi_reduction <add>, %83, %cst_70 [1] : vector<8x64xf32> to vector<8xf32>
    %85 = vector.shape_cast %84 : vector<8xf32> to vector<8x1xf32>
    %cst_71 = arith.constant dense<0.000000e+00> : vector<8x1xf32>
    %86 = tpu.matmul %0, %85, %cst_71 {dimension_numbers = #tpu.dot_dimension_numbers<[1], [0], [0], [1], [0, 0, 1, 1], [], []>} : vector<8x8xf32>, vector<8x1xf32>, vector<8x1xf32> -> vector<8x1xf32>
    %cst_72 = arith.constant 7.812500e-03 : f32
    %87 = vector.broadcast %cst_72 : f32 to vector<8x1xf32>
    %88 = arith.mulf %86, %87 : vector<8x1xf32>
    %c0_73 = arith.constant 0 : index
    %c0_74 = arith.constant 0 : index
    %89 = vector.load %arg2[%c0_73, %c0_74] : memref<8x6xf32, #tpu.memory_space<vmem>>, vector<8x1xf32>
    %c0_75 = arith.constant 0 : index
    %c1_76 = arith.constant 1 : index
    %90 = vector.load %arg2[%c0_75, %c1_76] : memref<8x6xf32, #tpu.memory_space<vmem>>, vector<8x1xf32>
    %cst_77 = arith.constant 9.99999974E-6 : f32
    %91 = vector.broadcast %cst_77 : f32 to vector<8x1xf32>
    %92 = arith.addf %88, %91 : vector<8x1xf32>
    %93 = math.rsqrt %92 : vector<8x1xf32>
    %94 = arith.mulf %89, %93 : vector<8x1xf32>
    %95 = vector.broadcast %94 : vector<8x1xf32> to vector<8x64xf32>
    %96 = arith.mulf %82, %95 : vector<8x64xf32>
    %97 = vector.broadcast %90 : vector<8x1xf32> to vector<8x64xf32>
    %98 = arith.addf %96, %97 : vector<8x64xf32>
    %cst_78 = arith.constant 0.000000e+00 : f32
    %99 = vector.broadcast %cst_78 : f32 to vector<8x64xf32>
    %100 = arith.maximumf %98, %99 : vector<8x64xf32>
    %101 = arith.truncf %100 : vector<8x64xf32> to vector<8x64xbf16>
    %cst_79 = arith.constant 0.000000e+00 : f32
    %102 = vector.broadcast %cst_79 : f32 to vector<8x16xf32>
    %c0_80 = arith.constant 0 : index
    %c0_81 = arith.constant 0 : index
    %c0_82 = arith.constant 0 : index
    %103 = vector.load %arg7[%c0_80, %c0_81, %c0_82] : memref<9x64x16xbf16, #tpu.memory_space<vmem>>, vector<1x64x16xbf16>
    %104 = vector.shape_cast %103 : vector<1x64x16xbf16> to vector<64x16xbf16>
    %cst_83 = arith.constant dense<0.000000e+00> : vector<8x16xf32>
    %105 = tpu.matmul %101, %104, %cst_83 {dimension_numbers = #tpu.dot_dimension_numbers<[1], [0], [0], [1], [0, 0, 1, 1], [], []>} : vector<8x64xbf16>, vector<64x16xbf16>, vector<8x16xf32> -> vector<8x16xf32>
    %c0_84 = arith.constant 0 : index
    %c0_85 = arith.constant 0 : index
    %c0_86 = arith.constant 0 : index
    %106 = vector.load %arg6[%c0_84, %c0_85, %c0_86] : memref<9x8x8xbf16, #tpu.memory_space<vmem>>, vector<1x8x8xbf16>
    %107 = vector.shape_cast %106 : vector<1x8x8xbf16> to vector<8x8xbf16>
    %108 = arith.truncf %105 : vector<8x16xf32> to vector<8x16xbf16>
    %cst_87 = arith.constant dense<0.000000e+00> : vector<8x16xf32>
    %109 = tpu.matmul %107, %108, %cst_87 {dimension_numbers = #tpu.dot_dimension_numbers<[1], [0], [0], [1], [0, 0, 1, 1], [], []>} : vector<8x8xbf16>, vector<8x16xbf16>, vector<8x16xf32> -> vector<8x16xf32>
    %110 = arith.addf %102, %109 : vector<8x16xf32>
    %c1_88 = arith.constant 1 : index
    %c0_89 = arith.constant 0 : index
    %c0_90 = arith.constant 0 : index
    %111 = vector.load %arg7[%c1_88, %c0_89, %c0_90] : memref<9x64x16xbf16, #tpu.memory_space<vmem>>, vector<1x64x16xbf16>
    %112 = vector.shape_cast %111 : vector<1x64x16xbf16> to vector<64x16xbf16>
    %cst_91 = arith.constant dense<0.000000e+00> : vector<8x16xf32>
    %113 = tpu.matmul %101, %112, %cst_91 {dimension_numbers = #tpu.dot_dimension_numbers<[1], [0], [0], [1], [0, 0, 1, 1], [], []>} : vector<8x64xbf16>, vector<64x16xbf16>, vector<8x16xf32> -> vector<8x16xf32>
    %c1_92 = arith.constant 1 : index
    %c0_93 = arith.constant 0 : index
    %c0_94 = arith.constant 0 : index
    %114 = vector.load %arg6[%c1_92, %c0_93, %c0_94] : memref<9x8x8xbf16, #tpu.memory_space<vmem>>, vector<1x8x8xbf16>
    %115 = vector.shape_cast %114 : vector<1x8x8xbf16> to vector<8x8xbf16>
    %116 = arith.truncf %113 : vector<8x16xf32> to vector<8x16xbf16>
    %cst_95 = arith.constant dense<0.000000e+00> : vector<8x16xf32>
    %117 = tpu.matmul %115, %116, %cst_95 {dimension_numbers = #tpu.dot_dimension_numbers<[1], [0], [0], [1], [0, 0, 1, 1], [], []>} : vector<8x8xbf16>, vector<8x16xbf16>, vector<8x16xf32> -> vector<8x16xf32>
    %118 = arith.addf %110, %117 : vector<8x16xf32>
    %c2_96 = arith.constant 2 : index
    %c0_97 = arith.constant 0 : index
    %c0_98 = arith.constant 0 : index
    %119 = vector.load %arg7[%c2_96, %c0_97, %c0_98] : memref<9x64x16xbf16, #tpu.memory_space<vmem>>, vector<1x64x16xbf16>
    %120 = vector.shape_cast %119 : vector<1x64x16xbf16> to vector<64x16xbf16>
    %cst_99 = arith.constant dense<0.000000e+00> : vector<8x16xf32>
    %121 = tpu.matmul %101, %120, %cst_99 {dimension_numbers = #tpu.dot_dimension_numbers<[1], [0], [0], [1], [0, 0, 1, 1], [], []>} : vector<8x64xbf16>, vector<64x16xbf16>, vector<8x16xf32> -> vector<8x16xf32>
    %c2_100 = arith.constant 2 : index
    %c0_101 = arith.constant 0 : index
    %c0_102 = arith.constant 0 : index
    %122 = vector.load %arg6[%c2_100, %c0_101, %c0_102] : memref<9x8x8xbf16, #tpu.memory_space<vmem>>, vector<1x8x8xbf16>
    %123 = vector.shape_cast %122 : vector<1x8x8xbf16> to vector<8x8xbf16>
    %124 = arith.truncf %121 : vector<8x16xf32> to vector<8x16xbf16>
    %cst_103 = arith.constant dense<0.000000e+00> : vector<8x16xf32>
    %125 = tpu.matmul %123, %124, %cst_103 {dimension_numbers = #tpu.dot_dimension_numbers<[1], [0], [0], [1], [0, 0, 1, 1], [], []>} : vector<8x8xbf16>, vector<8x16xbf16>, vector<8x16xf32> -> vector<8x16xf32>
    %126 = arith.addf %118, %125 : vector<8x16xf32>
    %c3_104 = arith.constant 3 : index
    %c0_105 = arith.constant 0 : index
    %c0_106 = arith.constant 0 : index
    %127 = vector.load %arg7[%c3_104, %c0_105, %c0_106] : memref<9x64x16xbf16, #tpu.memory_space<vmem>>, vector<1x64x16xbf16>
    %128 = vector.shape_cast %127 : vector<1x64x16xbf16> to vector<64x16xbf16>
    %cst_107 = arith.constant dense<0.000000e+00> : vector<8x16xf32>
    %129 = tpu.matmul %101, %128, %cst_107 {dimension_numbers = #tpu.dot_dimension_numbers<[1], [0], [0], [1], [0, 0, 1, 1], [], []>} : vector<8x64xbf16>, vector<64x16xbf16>, vector<8x16xf32> -> vector<8x16xf32>
    %c3_108 = arith.constant 3 : index
    %c0_109 = arith.constant 0 : index
    %c0_110 = arith.constant 0 : index
    %130 = vector.load %arg6[%c3_108, %c0_109, %c0_110] : memref<9x8x8xbf16, #tpu.memory_space<vmem>>, vector<1x8x8xbf16>
    %131 = vector.shape_cast %130 : vector<1x8x8xbf16> to vector<8x8xbf16>
    %132 = arith.truncf %129 : vector<8x16xf32> to vector<8x16xbf16>
    %cst_111 = arith.constant dense<0.000000e+00> : vector<8x16xf32>
    %133 = tpu.matmul %131, %132, %cst_111 {dimension_numbers = #tpu.dot_dimension_numbers<[1], [0], [0], [1], [0, 0, 1, 1], [], []>} : vector<8x8xbf16>, vector<8x16xbf16>, vector<8x16xf32> -> vector<8x16xf32>
    %134 = arith.addf %126, %133 : vector<8x16xf32>
    %c4_112 = arith.constant 4 : index
    %c0_113 = arith.constant 0 : index
    %c0_114 = arith.constant 0 : index
    %135 = vector.load %arg7[%c4_112, %c0_113, %c0_114] : memref<9x64x16xbf16, #tpu.memory_space<vmem>>, vector<1x64x16xbf16>
    %136 = vector.shape_cast %135 : vector<1x64x16xbf16> to vector<64x16xbf16>
    %cst_115 = arith.constant dense<0.000000e+00> : vector<8x16xf32>
    %137 = tpu.matmul %101, %136, %cst_115 {dimension_numbers = #tpu.dot_dimension_numbers<[1], [0], [0], [1], [0, 0, 1, 1], [], []>} : vector<8x64xbf16>, vector<64x16xbf16>, vector<8x16xf32> -> vector<8x16xf32>
    %c4_116 = arith.constant 4 : index
    %c0_117 = arith.constant 0 : index
    %c0_118 = arith.constant 0 : index
    %138 = vector.load %arg6[%c4_116, %c0_117, %c0_118] : memref<9x8x8xbf16, #tpu.memory_space<vmem>>, vector<1x8x8xbf16>
    %139 = vector.shape_cast %138 : vector<1x8x8xbf16> to vector<8x8xbf16>
    %140 = arith.truncf %137 : vector<8x16xf32> to vector<8x16xbf16>
    %cst_119 = arith.constant dense<0.000000e+00> : vector<8x16xf32>
    %141 = tpu.matmul %139, %140, %cst_119 {dimension_numbers = #tpu.dot_dimension_numbers<[1], [0], [0], [1], [0, 0, 1, 1], [], []>} : vector<8x8xbf16>, vector<8x16xbf16>, vector<8x16xf32> -> vector<8x16xf32>
    %142 = arith.addf %134, %141 : vector<8x16xf32>
    %c5_120 = arith.constant 5 : index
    %c0_121 = arith.constant 0 : index
    %c0_122 = arith.constant 0 : index
    %143 = vector.load %arg7[%c5_120, %c0_121, %c0_122] : memref<9x64x16xbf16, #tpu.memory_space<vmem>>, vector<1x64x16xbf16>
    %144 = vector.shape_cast %143 : vector<1x64x16xbf16> to vector<64x16xbf16>
    %cst_123 = arith.constant dense<0.000000e+00> : vector<8x16xf32>
    %145 = tpu.matmul %101, %144, %cst_123 {dimension_numbers = #tpu.dot_dimension_numbers<[1], [0], [0], [1], [0, 0, 1, 1], [], []>} : vector<8x64xbf16>, vector<64x16xbf16>, vector<8x16xf32> -> vector<8x16xf32>
    %c5_124 = arith.constant 5 : index
    %c0_125 = arith.constant 0 : index
    %c0_126 = arith.constant 0 : index
    %146 = vector.load %arg6[%c5_124, %c0_125, %c0_126] : memref<9x8x8xbf16, #tpu.memory_space<vmem>>, vector<1x8x8xbf16>
    %147 = vector.shape_cast %146 : vector<1x8x8xbf16> to vector<8x8xbf16>
    %148 = arith.truncf %145 : vector<8x16xf32> to vector<8x16xbf16>
    %cst_127 = arith.constant dense<0.000000e+00> : vector<8x16xf32>
    %149 = tpu.matmul %147, %148, %cst_127 {dimension_numbers = #tpu.dot_dimension_numbers<[1], [0], [0], [1], [0, 0, 1, 1], [], []>} : vector<8x8xbf16>, vector<8x16xbf16>, vector<8x16xf32> -> vector<8x16xf32>
    %150 = arith.addf %142, %149 : vector<8x16xf32>
    %c6_128 = arith.constant 6 : index
    %c0_129 = arith.constant 0 : index
    %c0_130 = arith.constant 0 : index
    %151 = vector.load %arg7[%c6_128, %c0_129, %c0_130] : memref<9x64x16xbf16, #tpu.memory_space<vmem>>, vector<1x64x16xbf16>
    %152 = vector.shape_cast %151 : vector<1x64x16xbf16> to vector<64x16xbf16>
    %cst_131 = arith.constant dense<0.000000e+00> : vector<8x16xf32>
    %153 = tpu.matmul %101, %152, %cst_131 {dimension_numbers = #tpu.dot_dimension_numbers<[1], [0], [0], [1], [0, 0, 1, 1], [], []>} : vector<8x64xbf16>, vector<64x16xbf16>, vector<8x16xf32> -> vector<8x16xf32>
    %c6_132 = arith.constant 6 : index
    %c0_133 = arith.constant 0 : index
    %c0_134 = arith.constant 0 : index
    %154 = vector.load %arg6[%c6_132, %c0_133, %c0_134] : memref<9x8x8xbf16, #tpu.memory_space<vmem>>, vector<1x8x8xbf16>
    %155 = vector.shape_cast %154 : vector<1x8x8xbf16> to vector<8x8xbf16>
    %156 = arith.truncf %153 : vector<8x16xf32> to vector<8x16xbf16>
    %cst_135 = arith.constant dense<0.000000e+00> : vector<8x16xf32>
    %157 = tpu.matmul %155, %156, %cst_135 {dimension_numbers = #tpu.dot_dimension_numbers<[1], [0], [0], [1], [0, 0, 1, 1], [], []>} : vector<8x8xbf16>, vector<8x16xbf16>, vector<8x16xf32> -> vector<8x16xf32>
    %158 = arith.addf %150, %157 : vector<8x16xf32>
    %c7_136 = arith.constant 7 : index
    %c0_137 = arith.constant 0 : index
    %c0_138 = arith.constant 0 : index
    %159 = vector.load %arg7[%c7_136, %c0_137, %c0_138] : memref<9x64x16xbf16, #tpu.memory_space<vmem>>, vector<1x64x16xbf16>
    %160 = vector.shape_cast %159 : vector<1x64x16xbf16> to vector<64x16xbf16>
    %cst_139 = arith.constant dense<0.000000e+00> : vector<8x16xf32>
    %161 = tpu.matmul %101, %160, %cst_139 {dimension_numbers = #tpu.dot_dimension_numbers<[1], [0], [0], [1], [0, 0, 1, 1], [], []>} : vector<8x64xbf16>, vector<64x16xbf16>, vector<8x16xf32> -> vector<8x16xf32>
    %c7_140 = arith.constant 7 : index
    %c0_141 = arith.constant 0 : index
    %c0_142 = arith.constant 0 : index
    %162 = vector.load %arg6[%c7_140, %c0_141, %c0_142] : memref<9x8x8xbf16, #tpu.memory_space<vmem>>, vector<1x8x8xbf16>
    %163 = vector.shape_cast %162 : vector<1x8x8xbf16> to vector<8x8xbf16>
    %164 = arith.truncf %161 : vector<8x16xf32> to vector<8x16xbf16>
    %cst_143 = arith.constant dense<0.000000e+00> : vector<8x16xf32>
    %165 = tpu.matmul %163, %164, %cst_143 {dimension_numbers = #tpu.dot_dimension_numbers<[1], [0], [0], [1], [0, 0, 1, 1], [], []>} : vector<8x8xbf16>, vector<8x16xbf16>, vector<8x16xf32> -> vector<8x16xf32>
    %166 = arith.addf %158, %165 : vector<8x16xf32>
    %c8_144 = arith.constant 8 : index
    %c0_145 = arith.constant 0 : index
    %c0_146 = arith.constant 0 : index
    %167 = vector.load %arg7[%c8_144, %c0_145, %c0_146] : memref<9x64x16xbf16, #tpu.memory_space<vmem>>, vector<1x64x16xbf16>
    %168 = vector.shape_cast %167 : vector<1x64x16xbf16> to vector<64x16xbf16>
    %cst_147 = arith.constant dense<0.000000e+00> : vector<8x16xf32>
    %169 = tpu.matmul %101, %168, %cst_147 {dimension_numbers = #tpu.dot_dimension_numbers<[1], [0], [0], [1], [0, 0, 1, 1], [], []>} : vector<8x64xbf16>, vector<64x16xbf16>, vector<8x16xf32> -> vector<8x16xf32>
    %c8_148 = arith.constant 8 : index
    %c0_149 = arith.constant 0 : index
    %c0_150 = arith.constant 0 : index
    %170 = vector.load %arg6[%c8_148, %c0_149, %c0_150] : memref<9x8x8xbf16, #tpu.memory_space<vmem>>, vector<1x8x8xbf16>
    %171 = vector.shape_cast %170 : vector<1x8x8xbf16> to vector<8x8xbf16>
    %172 = arith.truncf %169 : vector<8x16xf32> to vector<8x16xbf16>
    %cst_151 = arith.constant dense<0.000000e+00> : vector<8x16xf32>
    %173 = tpu.matmul %171, %172, %cst_151 {dimension_numbers = #tpu.dot_dimension_numbers<[1], [0], [0], [1], [0, 0, 1, 1], [], []>} : vector<8x8xbf16>, vector<8x16xbf16>, vector<8x16xf32> -> vector<8x16xf32>
    %174 = arith.addf %166, %173 : vector<8x16xf32>
    %cst_152 = arith.constant dense<0.000000e+00> : vector<8xf32>
    %175 = vector.multi_reduction <add>, %174, %cst_152 [1] : vector<8x16xf32> to vector<8xf32>
    %176 = vector.shape_cast %175 : vector<8xf32> to vector<8x1xf32>
    %cst_153 = arith.constant dense<0.000000e+00> : vector<8x1xf32>
    %177 = tpu.matmul %0, %176, %cst_153 {dimension_numbers = #tpu.dot_dimension_numbers<[1], [0], [0], [1], [0, 0, 1, 1], [], []>} : vector<8x8xf32>, vector<8x1xf32>, vector<8x1xf32> -> vector<8x1xf32>
    %cst_154 = arith.constant 3.125000e-02 : f32
    %178 = vector.broadcast %cst_154 : f32 to vector<8x1xf32>
    %179 = arith.mulf %177, %178 : vector<8x1xf32>
    %180 = vector.broadcast %179 : vector<8x1xf32> to vector<8x16xf32>
    %181 = arith.subf %174, %180 : vector<8x16xf32>
    %182 = arith.mulf %181, %181 : vector<8x16xf32>
    %cst_155 = arith.constant dense<0.000000e+00> : vector<8xf32>
    %183 = vector.multi_reduction <add>, %182, %cst_155 [1] : vector<8x16xf32> to vector<8xf32>
    %184 = vector.shape_cast %183 : vector<8xf32> to vector<8x1xf32>
    %cst_156 = arith.constant dense<0.000000e+00> : vector<8x1xf32>
    %185 = tpu.matmul %0, %184, %cst_156 {dimension_numbers = #tpu.dot_dimension_numbers<[1], [0], [0], [1], [0, 0, 1, 1], [], []>} : vector<8x8xf32>, vector<8x1xf32>, vector<8x1xf32> -> vector<8x1xf32>
    %cst_157 = arith.constant 3.125000e-02 : f32
    %186 = vector.broadcast %cst_157 : f32 to vector<8x1xf32>
    %187 = arith.mulf %185, %186 : vector<8x1xf32>
    %c0_158 = arith.constant 0 : index
    %c2_159 = arith.constant 2 : index
    %188 = vector.load %arg2[%c0_158, %c2_159] : memref<8x6xf32, #tpu.memory_space<vmem>>, vector<8x1xf32>
    %c0_160 = arith.constant 0 : index
    %c3_161 = arith.constant 3 : index
    %189 = vector.load %arg2[%c0_160, %c3_161] : memref<8x6xf32, #tpu.memory_space<vmem>>, vector<8x1xf32>
    %cst_162 = arith.constant 9.99999974E-6 : f32
    %190 = vector.broadcast %cst_162 : f32 to vector<8x1xf32>
    %191 = arith.addf %187, %190 : vector<8x1xf32>
    %192 = math.rsqrt %191 : vector<8x1xf32>
    %193 = arith.mulf %188, %192 : vector<8x1xf32>
    %194 = vector.broadcast %193 : vector<8x1xf32> to vector<8x16xf32>
    %195 = arith.mulf %181, %194 : vector<8x16xf32>
    %196 = vector.broadcast %189 : vector<8x1xf32> to vector<8x16xf32>
    %197 = arith.addf %195, %196 : vector<8x16xf32>
    %cst_163 = arith.constant 0.000000e+00 : f32
    %198 = vector.broadcast %cst_163 : f32 to vector<8x16xf32>
    %199 = arith.maximumf %197, %198 : vector<8x16xf32>
    %200 = arith.truncf %199 : vector<8x16xf32> to vector<8x16xbf16>
    %cst_164 = arith.constant 0.000000e+00 : f32
    %201 = vector.broadcast %cst_164 : f32 to vector<8x4xf32>
    %c0_165 = arith.constant 0 : index
    %c0_166 = arith.constant 0 : index
    %c0_167 = arith.constant 0 : index
    %202 = vector.load %arg9[%c0_165, %c0_166, %c0_167] : memref<9x16x4xbf16, #tpu.memory_space<vmem>>, vector<1x16x4xbf16>
    %203 = vector.shape_cast %202 : vector<1x16x4xbf16> to vector<16x4xbf16>
    %cst_168 = arith.constant dense<0.000000e+00> : vector<8x4xf32>
    %204 = tpu.matmul %200, %203, %cst_168 {dimension_numbers = #tpu.dot_dimension_numbers<[1], [0], [0], [1], [0, 0, 1, 1], [], []>} : vector<8x16xbf16>, vector<16x4xbf16>, vector<8x4xf32> -> vector<8x4xf32>
    %c0_169 = arith.constant 0 : index
    %c0_170 = arith.constant 0 : index
    %c0_171 = arith.constant 0 : index
    %205 = vector.load %arg8[%c0_169, %c0_170, %c0_171] : memref<9x8x8xbf16, #tpu.memory_space<vmem>>, vector<1x8x8xbf16>
    %206 = vector.shape_cast %205 : vector<1x8x8xbf16> to vector<8x8xbf16>
    %207 = arith.truncf %204 : vector<8x4xf32> to vector<8x4xbf16>
    %cst_172 = arith.constant dense<0.000000e+00> : vector<8x4xf32>
    %208 = tpu.matmul %206, %207, %cst_172 {dimension_numbers = #tpu.dot_dimension_numbers<[1], [0], [0], [1], [0, 0, 1, 1], [], []>} : vector<8x8xbf16>, vector<8x4xbf16>, vector<8x4xf32> -> vector<8x4xf32>
    %209 = arith.addf %201, %208 : vector<8x4xf32>
    %c1_173 = arith.constant 1 : index
    %c0_174 = arith.constant 0 : index
    %c0_175 = arith.constant 0 : index
    %210 = vector.load %arg9[%c1_173, %c0_174, %c0_175] : memref<9x16x4xbf16, #tpu.memory_space<vmem>>, vector<1x16x4xbf16>
    %211 = vector.shape_cast %210 : vector<1x16x4xbf16> to vector<16x4xbf16>
    %cst_176 = arith.constant dense<0.000000e+00> : vector<8x4xf32>
    %212 = tpu.matmul %200, %211, %cst_176 {dimension_numbers = #tpu.dot_dimension_numbers<[1], [0], [0], [1], [0, 0, 1, 1], [], []>} : vector<8x16xbf16>, vector<16x4xbf16>, vector<8x4xf32> -> vector<8x4xf32>
    %c1_177 = arith.constant 1 : index
    %c0_178 = arith.constant 0 : index
    %c0_179 = arith.constant 0 : index
    %213 = vector.load %arg8[%c1_177, %c0_178, %c0_179] : memref<9x8x8xbf16, #tpu.memory_space<vmem>>, vector<1x8x8xbf16>
    %214 = vector.shape_cast %213 : vector<1x8x8xbf16> to vector<8x8xbf16>
    %215 = arith.truncf %212 : vector<8x4xf32> to vector<8x4xbf16>
    %cst_180 = arith.constant dense<0.000000e+00> : vector<8x4xf32>
    %216 = tpu.matmul %214, %215, %cst_180 {dimension_numbers = #tpu.dot_dimension_numbers<[1], [0], [0], [1], [0, 0, 1, 1], [], []>} : vector<8x8xbf16>, vector<8x4xbf16>, vector<8x4xf32> -> vector<8x4xf32>
    %217 = arith.addf %209, %216 : vector<8x4xf32>
    %c2_181 = arith.constant 2 : index
    %c0_182 = arith.constant 0 : index
    %c0_183 = arith.constant 0 : index
    %218 = vector.load %arg9[%c2_181, %c0_182, %c0_183] : memref<9x16x4xbf16, #tpu.memory_space<vmem>>, vector<1x16x4xbf16>
    %219 = vector.shape_cast %218 : vector<1x16x4xbf16> to vector<16x4xbf16>
    %cst_184 = arith.constant dense<0.000000e+00> : vector<8x4xf32>
    %220 = tpu.matmul %200, %219, %cst_184 {dimension_numbers = #tpu.dot_dimension_numbers<[1], [0], [0], [1], [0, 0, 1, 1], [], []>} : vector<8x16xbf16>, vector<16x4xbf16>, vector<8x4xf32> -> vector<8x4xf32>
    %c2_185 = arith.constant 2 : index
    %c0_186 = arith.constant 0 : index
    %c0_187 = arith.constant 0 : index
    %221 = vector.load %arg8[%c2_185, %c0_186, %c0_187] : memref<9x8x8xbf16, #tpu.memory_space<vmem>>, vector<1x8x8xbf16>
    %222 = vector.shape_cast %221 : vector<1x8x8xbf16> to vector<8x8xbf16>
    %223 = arith.truncf %220 : vector<8x4xf32> to vector<8x4xbf16>
    %cst_188 = arith.constant dense<0.000000e+00> : vector<8x4xf32>
    %224 = tpu.matmul %222, %223, %cst_188 {dimension_numbers = #tpu.dot_dimension_numbers<[1], [0], [0], [1], [0, 0, 1, 1], [], []>} : vector<8x8xbf16>, vector<8x4xbf16>, vector<8x4xf32> -> vector<8x4xf32>
    %225 = arith.addf %217, %224 : vector<8x4xf32>
    %c3_189 = arith.constant 3 : index
    %c0_190 = arith.constant 0 : index
    %c0_191 = arith.constant 0 : index
    %226 = vector.load %arg9[%c3_189, %c0_190, %c0_191] : memref<9x16x4xbf16, #tpu.memory_space<vmem>>, vector<1x16x4xbf16>
    %227 = vector.shape_cast %226 : vector<1x16x4xbf16> to vector<16x4xbf16>
    %cst_192 = arith.constant dense<0.000000e+00> : vector<8x4xf32>
    %228 = tpu.matmul %200, %227, %cst_192 {dimension_numbers = #tpu.dot_dimension_numbers<[1], [0], [0], [1], [0, 0, 1, 1], [], []>} : vector<8x16xbf16>, vector<16x4xbf16>, vector<8x4xf32> -> vector<8x4xf32>
    %c3_193 = arith.constant 3 : index
    %c0_194 = arith.constant 0 : index
    %c0_195 = arith.constant 0 : index
    %229 = vector.load %arg8[%c3_193, %c0_194, %c0_195] : memref<9x8x8xbf16, #tpu.memory_space<vmem>>, vector<1x8x8xbf16>
    %230 = vector.shape_cast %229 : vector<1x8x8xbf16> to vector<8x8xbf16>
    %231 = arith.truncf %228 : vector<8x4xf32> to vector<8x4xbf16>
    %cst_196 = arith.constant dense<0.000000e+00> : vector<8x4xf32>
    %232 = tpu.matmul %230, %231, %cst_196 {dimension_numbers = #tpu.dot_dimension_numbers<[1], [0], [0], [1], [0, 0, 1, 1], [], []>} : vector<8x8xbf16>, vector<8x4xbf16>, vector<8x4xf32> -> vector<8x4xf32>
    %233 = arith.addf %225, %232 : vector<8x4xf32>
    %c4_197 = arith.constant 4 : index
    %c0_198 = arith.constant 0 : index
    %c0_199 = arith.constant 0 : index
    %234 = vector.load %arg9[%c4_197, %c0_198, %c0_199] : memref<9x16x4xbf16, #tpu.memory_space<vmem>>, vector<1x16x4xbf16>
    %235 = vector.shape_cast %234 : vector<1x16x4xbf16> to vector<16x4xbf16>
    %cst_200 = arith.constant dense<0.000000e+00> : vector<8x4xf32>
    %236 = tpu.matmul %200, %235, %cst_200 {dimension_numbers = #tpu.dot_dimension_numbers<[1], [0], [0], [1], [0, 0, 1, 1], [], []>} : vector<8x16xbf16>, vector<16x4xbf16>, vector<8x4xf32> -> vector<8x4xf32>
    %c4_201 = arith.constant 4 : index
    %c0_202 = arith.constant 0 : index
    %c0_203 = arith.constant 0 : index
    %237 = vector.load %arg8[%c4_201, %c0_202, %c0_203] : memref<9x8x8xbf16, #tpu.memory_space<vmem>>, vector<1x8x8xbf16>
    %238 = vector.shape_cast %237 : vector<1x8x8xbf16> to vector<8x8xbf16>
    %239 = arith.truncf %236 : vector<8x4xf32> to vector<8x4xbf16>
    %cst_204 = arith.constant dense<0.000000e+00> : vector<8x4xf32>
    %240 = tpu.matmul %238, %239, %cst_204 {dimension_numbers = #tpu.dot_dimension_numbers<[1], [0], [0], [1], [0, 0, 1, 1], [], []>} : vector<8x8xbf16>, vector<8x4xbf16>, vector<8x4xf32> -> vector<8x4xf32>
    %241 = arith.addf %233, %240 : vector<8x4xf32>
    %c5_205 = arith.constant 5 : index
    %c0_206 = arith.constant 0 : index
    %c0_207 = arith.constant 0 : index
    %242 = vector.load %arg9[%c5_205, %c0_206, %c0_207] : memref<9x16x4xbf16, #tpu.memory_space<vmem>>, vector<1x16x4xbf16>
    %243 = vector.shape_cast %242 : vector<1x16x4xbf16> to vector<16x4xbf16>
    %cst_208 = arith.constant dense<0.000000e+00> : vector<8x4xf32>
    %244 = tpu.matmul %200, %243, %cst_208 {dimension_numbers = #tpu.dot_dimension_numbers<[1], [0], [0], [1], [0, 0, 1, 1], [], []>} : vector<8x16xbf16>, vector<16x4xbf16>, vector<8x4xf32> -> vector<8x4xf32>
    %c5_209 = arith.constant 5 : index
    %c0_210 = arith.constant 0 : index
    %c0_211 = arith.constant 0 : index
    %245 = vector.load %arg8[%c5_209, %c0_210, %c0_211] : memref<9x8x8xbf16, #tpu.memory_space<vmem>>, vector<1x8x8xbf16>
    %246 = vector.shape_cast %245 : vector<1x8x8xbf16> to vector<8x8xbf16>
    %247 = arith.truncf %244 : vector<8x4xf32> to vector<8x4xbf16>
    %cst_212 = arith.constant dense<0.000000e+00> : vector<8x4xf32>
    %248 = tpu.matmul %246, %247, %cst_212 {dimension_numbers = #tpu.dot_dimension_numbers<[1], [0], [0], [1], [0, 0, 1, 1], [], []>} : vector<8x8xbf16>, vector<8x4xbf16>, vector<8x4xf32> -> vector<8x4xf32>
    %249 = arith.addf %241, %248 : vector<8x4xf32>
    %c6_213 = arith.constant 6 : index
    %c0_214 = arith.constant 0 : index
    %c0_215 = arith.constant 0 : index
    %250 = vector.load %arg9[%c6_213, %c0_214, %c0_215] : memref<9x16x4xbf16, #tpu.memory_space<vmem>>, vector<1x16x4xbf16>
    %251 = vector.shape_cast %250 : vector<1x16x4xbf16> to vector<16x4xbf16>
    %cst_216 = arith.constant dense<0.000000e+00> : vector<8x4xf32>
    %252 = tpu.matmul %200, %251, %cst_216 {dimension_numbers = #tpu.dot_dimension_numbers<[1], [0], [0], [1], [0, 0, 1, 1], [], []>} : vector<8x16xbf16>, vector<16x4xbf16>, vector<8x4xf32> -> vector<8x4xf32>
    %c6_217 = arith.constant 6 : index
    %c0_218 = arith.constant 0 : index
    %c0_219 = arith.constant 0 : index
    %253 = vector.load %arg8[%c6_217, %c0_218, %c0_219] : memref<9x8x8xbf16, #tpu.memory_space<vmem>>, vector<1x8x8xbf16>
    %254 = vector.shape_cast %253 : vector<1x8x8xbf16> to vector<8x8xbf16>
    %255 = arith.truncf %252 : vector<8x4xf32> to vector<8x4xbf16>
    %cst_220 = arith.constant dense<0.000000e+00> : vector<8x4xf32>
    %256 = tpu.matmul %254, %255, %cst_220 {dimension_numbers = #tpu.dot_dimension_numbers<[1], [0], [0], [1], [0, 0, 1, 1], [], []>} : vector<8x8xbf16>, vector<8x4xbf16>, vector<8x4xf32> -> vector<8x4xf32>
    %257 = arith.addf %249, %256 : vector<8x4xf32>
    %c7_221 = arith.constant 7 : index
    %c0_222 = arith.constant 0 : index
    %c0_223 = arith.constant 0 : index
    %258 = vector.load %arg9[%c7_221, %c0_222, %c0_223] : memref<9x16x4xbf16, #tpu.memory_space<vmem>>, vector<1x16x4xbf16>
    %259 = vector.shape_cast %258 : vector<1x16x4xbf16> to vector<16x4xbf16>
    %cst_224 = arith.constant dense<0.000000e+00> : vector<8x4xf32>
    %260 = tpu.matmul %200, %259, %cst_224 {dimension_numbers = #tpu.dot_dimension_numbers<[1], [0], [0], [1], [0, 0, 1, 1], [], []>} : vector<8x16xbf16>, vector<16x4xbf16>, vector<8x4xf32> -> vector<8x4xf32>
    %c7_225 = arith.constant 7 : index
    %c0_226 = arith.constant 0 : index
    %c0_227 = arith.constant 0 : index
    %261 = vector.load %arg8[%c7_225, %c0_226, %c0_227] : memref<9x8x8xbf16, #tpu.memory_space<vmem>>, vector<1x8x8xbf16>
    %262 = vector.shape_cast %261 : vector<1x8x8xbf16> to vector<8x8xbf16>
    %263 = arith.truncf %260 : vector<8x4xf32> to vector<8x4xbf16>
    %cst_228 = arith.constant dense<0.000000e+00> : vector<8x4xf32>
    %264 = tpu.matmul %262, %263, %cst_228 {dimension_numbers = #tpu.dot_dimension_numbers<[1], [0], [0], [1], [0, 0, 1, 1], [], []>} : vector<8x8xbf16>, vector<8x4xbf16>, vector<8x4xf32> -> vector<8x4xf32>
    %265 = arith.addf %257, %264 : vector<8x4xf32>
    %c8_229 = arith.constant 8 : index
    %c0_230 = arith.constant 0 : index
    %c0_231 = arith.constant 0 : index
    %266 = vector.load %arg9[%c8_229, %c0_230, %c0_231] : memref<9x16x4xbf16, #tpu.memory_space<vmem>>, vector<1x16x4xbf16>
    %267 = vector.shape_cast %266 : vector<1x16x4xbf16> to vector<16x4xbf16>
    %cst_232 = arith.constant dense<0.000000e+00> : vector<8x4xf32>
    %268 = tpu.matmul %200, %267, %cst_232 {dimension_numbers = #tpu.dot_dimension_numbers<[1], [0], [0], [1], [0, 0, 1, 1], [], []>} : vector<8x16xbf16>, vector<16x4xbf16>, vector<8x4xf32> -> vector<8x4xf32>
    %c8_233 = arith.constant 8 : index
    %c0_234 = arith.constant 0 : index
    %c0_235 = arith.constant 0 : index
    %269 = vector.load %arg8[%c8_233, %c0_234, %c0_235] : memref<9x8x8xbf16, #tpu.memory_space<vmem>>, vector<1x8x8xbf16>
    %270 = vector.shape_cast %269 : vector<1x8x8xbf16> to vector<8x8xbf16>
    %271 = arith.truncf %268 : vector<8x4xf32> to vector<8x4xbf16>
    %cst_236 = arith.constant dense<0.000000e+00> : vector<8x4xf32>
    %272 = tpu.matmul %270, %271, %cst_236 {dimension_numbers = #tpu.dot_dimension_numbers<[1], [0], [0], [1], [0, 0, 1, 1], [], []>} : vector<8x8xbf16>, vector<8x4xbf16>, vector<8x4xf32> -> vector<8x4xf32>
    %273 = arith.addf %265, %272 : vector<8x4xf32>
    %cst_237 = arith.constant dense<0.000000e+00> : vector<8xf32>
    %274 = vector.multi_reduction <add>, %273, %cst_237 [1] : vector<8x4xf32> to vector<8xf32>
    %275 = vector.shape_cast %274 : vector<8xf32> to vector<8x1xf32>
    %cst_238 = arith.constant dense<0.000000e+00> : vector<8x1xf32>
    %276 = tpu.matmul %0, %275, %cst_238 {dimension_numbers = #tpu.dot_dimension_numbers<[1], [0], [0], [1], [0, 0, 1, 1], [], []>} : vector<8x8xf32>, vector<8x1xf32>, vector<8x1xf32> -> vector<8x1xf32>
    %cst_239 = arith.constant 1.250000e-01 : f32
    %277 = vector.broadcast %cst_239 : f32 to vector<8x1xf32>
    %278 = arith.mulf %276, %277 : vector<8x1xf32>
    %279 = vector.broadcast %278 : vector<8x1xf32> to vector<8x4xf32>
    %280 = arith.subf %273, %279 : vector<8x4xf32>
    %281 = arith.mulf %280, %280 : vector<8x4xf32>
    %cst_240 = arith.constant dense<0.000000e+00> : vector<8xf32>
    %282 = vector.multi_reduction <add>, %281, %cst_240 [1] : vector<8x4xf32> to vector<8xf32>
    %283 = vector.shape_cast %282 : vector<8xf32> to vector<8x1xf32>
    %cst_241 = arith.constant dense<0.000000e+00> : vector<8x1xf32>
    %284 = tpu.matmul %0, %283, %cst_241 {dimension_numbers = #tpu.dot_dimension_numbers<[1], [0], [0], [1], [0, 0, 1, 1], [], []>} : vector<8x8xf32>, vector<8x1xf32>, vector<8x1xf32> -> vector<8x1xf32>
    %cst_242 = arith.constant 1.250000e-01 : f32
    %285 = vector.broadcast %cst_242 : f32 to vector<8x1xf32>
    %286 = arith.mulf %284, %285 : vector<8x1xf32>
    %c0_243 = arith.constant 0 : index
    %c4_244 = arith.constant 4 : index
    %287 = vector.load %arg2[%c0_243, %c4_244] : memref<8x6xf32, #tpu.memory_space<vmem>>, vector<8x1xf32>
    %c0_245 = arith.constant 0 : index
    %c5_246 = arith.constant 5 : index
    %288 = vector.load %arg2[%c0_245, %c5_246] : memref<8x6xf32, #tpu.memory_space<vmem>>, vector<8x1xf32>
    %cst_247 = arith.constant 9.99999974E-6 : f32
    %289 = vector.broadcast %cst_247 : f32 to vector<8x1xf32>
    %290 = arith.addf %286, %289 : vector<8x1xf32>
    %291 = math.rsqrt %290 : vector<8x1xf32>
    %292 = arith.mulf %287, %291 : vector<8x1xf32>
    %293 = vector.broadcast %292 : vector<8x1xf32> to vector<8x4xf32>
    %294 = arith.mulf %280, %293 : vector<8x4xf32>
    %295 = vector.broadcast %288 : vector<8x1xf32> to vector<8x4xf32>
    %296 = arith.addf %294, %295 : vector<8x4xf32>
    %cst_248 = arith.constant 0.000000e+00 : f32
    %297 = vector.broadcast %cst_248 : f32 to vector<8x4xf32>
    %298 = arith.cmpf olt, %296, %297 : vector<8x4xf32>
    %cst_249 = arith.constant -1.000000e+00 : f32
    %cst_250 = arith.constant 1.000000e+00 : f32
    %299 = vector.broadcast %cst_249 : f32 to vector<8x4xf32>
    %300 = vector.broadcast %cst_250 : f32 to vector<8x4xf32>
    %301 = arith.select %298, %299, %300 : vector<8x4xi1>, vector<8x4xf32>
    %c0_251 = arith.constant 0 : index
    %c0_252 = arith.constant 0 : index
    %302 = vector.load %arg10[%c0_251, %c0_252] : memref<8x4xf32, #tpu.memory_space<vmem>>, vector<8x4xf32>
    tpu.vector_store %arg10[%c0_251, %c0_252], %301 {strides = array<i32>} : memref<8x4xf32, #tpu.memory_space<vmem>>, vector<8x4xf32>,
    return
  }
  func.func @transform_0(%arg0: i32) -> (i32, i32) {
    %c0_i32 = arith.constant 0 : i32
    %c0_i32_0 = arith.constant 0 : i32
    %c0_i32_1 = arith.constant 0 : i32
    return %c0_i32, %c0_i32_0 : i32, i32
  }
  func.func @transform_1(%arg0: i32) -> (i32, i32) {
    %c0_i32 = arith.constant 0 : i32
    %c0_i32_0 = arith.constant 0 : i32
    %c0_i32_1 = arith.constant 0 : i32
    return %c0_i32, %c0_i32_0 : i32, i32
  }
  func.func @transform_2(%arg0: i32) -> (i32, i32) {
    %c0_i32 = arith.constant 0 : i32
    %c0_i32_0 = arith.constant 0 : i32
    %c0_i32_1 = arith.constant 0 : i32
    return %c0_i32, %c0_i32_0 : i32, i32
  }
  func.func @transform_3(%arg0: i32) -> (i32, i32, i32) {
    %c0_i32 = arith.constant 0 : i32
    %c0_i32_0 = arith.constant 0 : i32
    %c0_i32_1 = arith.constant 0 : i32
    %c0_i32_2 = arith.constant 0 : i32
    return %c0_i32, %c0_i32_0, %c0_i32_1 : i32, i32, i32
  }
  func.func @transform_4(%arg0: i32) -> (i32, i32, i32) {
    %c0_i32 = arith.constant 0 : i32
    %c0_i32_0 = arith.constant 0 : i32
    %c0_i32_1 = arith.constant 0 : i32
    %c0_i32_2 = arith.constant 0 : i32
    return %c0_i32, %c0_i32_0, %c0_i32_1 : i32, i32, i32
  }
  func.func @transform_5(%arg0: i32) -> (i32, i32, i32) {
    %c0_i32 = arith.constant 0 : i32
    %c0_i32_0 = arith.constant 0 : i32
    %c0_i32_1 = arith.constant 0 : i32
    %c0_i32_2 = arith.constant 0 : i32
    return %c0_i32, %c0_i32_0, %c0_i32_1 : i32, i32, i32
  }
  func.func @transform_6(%arg0: i32) -> (i32, i32, i32) {
    %c0_i32 = arith.constant 0 : i32
    %c0_i32_0 = arith.constant 0 : i32
    %c0_i32_1 = arith.constant 0 : i32
    %c0_i32_2 = arith.constant 0 : i32
    return %c0_i32, %c0_i32_0, %c0_i32_1 : i32, i32, i32
  }
  func.func @transform_7(%arg0: i32) -> (i32, i32, i32) {
    %c0_i32 = arith.constant 0 : i32
    %c0_i32_0 = arith.constant 0 : i32
    %c0_i32_1 = arith.constant 0 : i32
    %c0_i32_2 = arith.constant 0 : i32
    return %c0_i32, %c0_i32_0, %c0_i32_1 : i32, i32, i32
  }
  func.func @transform_8(%arg0: i32) -> (i32, i32, i32) {
    %c0_i32 = arith.constant 0 : i32
    %c0_i32_0 = arith.constant 0 : i32
    %c0_i32_1 = arith.constant 0 : i32
    %c0_i32_2 = arith.constant 0 : i32
    return %c0_i32, %c0_i32_0, %c0_i32_1 : i32, i32, i32
  }
  func.func @transform_9(%arg0: i32) -> (i32, i32) {
    %c0_i32 = arith.constant 0 : i32
    %c0_i32_0 = arith.constant 0 : i32
    %c0_i32_1 = arith.constant 0 : i32
    return %c0_i32, %c0_i32_0 : i32, i32
  }
}

</mosaic_0001>

<bundles_post_ra>
// kernel: forward.1
= control target key start
LH: loop header
LB: loop body
LE: loop exit
PB: predicated region body
PF: predicated region fallthrough
CT: control target
= control target key end

     0   :  { %14 = vsyncpa [#allocation3], 0  ;;  %s5820_s30 = smov [#allocation2]   ;;  %s6441_s0 = inlined_call_operand.vmem [shape: f32[6,256], index: 0, kind: input, shape index: {}]   ;;  %s6442_s1 = inlined_call_operand.vmem [shape: f32[8,6], index: 1, kind: input, shape index: {}]   ;;  %s6443_s2 = inlined_call_operand.vmem [shape: f32[8,8], index: 2, kind: input, shape index: {}]   ;;  %s6444_s3 = inlined_call_operand.vmem [shape: bf16[9,8,6], index: 3, kind: input, shape index: {}]   ;;  %s6445_s4 = inlined_call_operand.hbm [shape: bf16[9,256,64], index: 4, kind: input, shape index: {}]   ;;  %s6446_s5 = inlined_call_operand.vmem [shape: bf16[9,8,8], index: 5, kind: input, shape index: {}]   ;;  %s6447_s6 = inlined_call_operand.vmem [shape: bf16[9,64,16], index: 6, kind: input, shape index: {}]   ;;  %s6448_s7 = inlined_call_operand.vmem [shape: bf16[9,8,8], index: 7, kind: input, shape index: {}]   ;;  %s6449_s8 = inlined_call_operand.vmem [shape: bf16[9,16,4], index: 8, kind: input, shape index: {}]   ;;  %s6450_s9 = inlined_call_operand.vmem [shape: f32[8,4], index: 9, kind: output, shape index: {}]  }
   0x1   :  { %s28_s10 = sshll.u32 %s5820_s30, 4  ;;  %s29_s10 = int_to_ptr.vmem [resolvable:$true] %s28_s10 }
   0x2   :  { %s5806_s11 = scalar_lea.vmem %s29_s10, 18432  ;;  %p5811_p1 = scmp.lt.s32.totalorder %s29_s10, %s29_s10 }
   0x3   :  { %p5807_p0 = scmp.ne.s32.totalorder %s29_s10, %s5806_s11  ;;  %p5812_p2 = scmp.lt.s32.totalorder %s5806_s11, %s5806_s11 }
   0x5   :  { %p5813_p3 = por %p5812_p2, %p5811_p1 }
   0x7   :  { %p5814_p4 = pnand %p5813_p3, %p5807_p0 }
   0x9   :  { %5817 = shalt.err (!%p5814_p4)
}
   0xa   :  { %s5821_s12 = smov 64   ;;  %s5822_s13 = smov 4  }
   0xb   :  { %34 = dma.hbm_to_vmem [thread:$0]  %s6445_s4, 18432, %s29_s10, [#allocation3], %s5821_s12, %s5821_s12, %s5822_s13  }
   0xc   :  { %5818 = dma.done.wait [#allocation3], 18432  }
   0xd   :  { %5819 = vsyncadd [#allocation3], 4294948864  ;;  %v5601_v0 = vld [vmem:[#allocation2 + $0xf8] sm:$0xff]   ;;  %v5605_v4 = vld [vmem:[#allocation2 + $0xf0] sm:$0xff]   ;;  %v5823_v36 = vmov 0.0   ;;  %vm5824_vm0 = vmmov 0  }
   0xe   :  { %v5602_v1 = vld [vmem:[#allocation2 + $0x78] sm:$0xff]   ;;  %4920 = vmatprep.subr.bf16.mxu1 %v5601_v0  ;;  %v5606_v5 = vld [vmem:[#allocation2 + $0x70] sm:$0xff]   ;;  %v5609_v8 = vld [vmem:[#allocation2 + $0xe8] sm:$0xff]   ;;  %vm398_vm1 = vcmask 1042432   ;;  %vm394_vm2 = vcmask 48128   ;;  %vm2021_vm3 = vcmask 523264  }
   0xf   :  { %v5603_v2 = vld [vmem:[#allocation2 + $0xb8] sm:$0xff]   ;;  %4898 = vmatprep.subr.bf16.mxu0 %v5602_v1  ;;  %v5607_v6 = vld [vmem:[#allocation2 + $0xb0] sm:$0xff]   ;;  %v5610_v9 = vld [vmem:[#allocation2 + $0x68] sm:$0xff]   ;;  %vm2025_vm4 = vcmask 64512   ;;  %vm2355_vm5 = vcmask 1043456   ;;  %vm3306_vm6 = vcmask 130048  }
  0x10   :  { %v5604_v3 = vld [vmem:[#allocation2 + $0x38] sm:$0xff]   ;;  %4921 = vmatpush3.bf16.msra.mxu1 %v5603_v2  ;;  %v5608_v7 = vld [vmem:[#allocation2 + $0x30] sm:$0xff]   ;;  %v5611_v10 = vld [vmem:[#allocation2 + $0xa8] sm:$0xff]   ;;  %vm4372_vm7 = vcmask 31744  }
  0x11   :  { %4899 = vmatpush3.bf16.msra.mxu0 %v5604_v3  ;;  %4922 = vmatprep.subr.bf16.mxu1 %v5605_v4  ;;  %v5612_v11 = vld [vmem:[#allocation2 + $0x28] sm:$0xff]   ;;  %v5613_v12 = vld [vmem:[#allocation2 + $0xe0] sm:$0xff]   ;;  %v5617_v16 = vld [vmem:[#allocation2 + $0xd8] sm:$0xff]  }
  0x12   :  { %4900 = vmatprep.subr.bf16.mxu0 %v5606_v5  ;;  %v5614_v13 = vld [vmem:[#allocation2 + $0x60] sm:$0xff]   ;;  %v5618_v17 = vld [vmem:[#allocation2 + $0x58] sm:$0xff]   ;;  %v5621_v20 = vld [vmem:[#allocation2 + $0xd0] sm:$0xff]  }
  0x13   :  { %v5615_v14 = vld [vmem:[#allocation2 + $0xa0] sm:$0xff]   ;;  %v5619_v18 = vld [vmem:[#allocation2 + $0x98] sm:$0xff]   ;;  %v5622_v21 = vld [vmem:[#allocation2 + $0x50] sm:$0xff]  }
  0x14   :  { %4923 = vmatpush3.bf16.msra.mxu1 %v5607_v6  ;;  %v5616_v15 = vld [vmem:[#allocation2 + $0x20] sm:$0xff]   ;;  %v5620_v19 = vld [vmem:[#allocation2 + $0x18] sm:$0xff]   ;;  %v5623_v22 = vld [vmem:[#allocation2 + $0x90] sm:$0xff]  }
  0x15   :  { %4901 = vmatpush3.bf16.msra.mxu0 %v5608_v7  ;;  %4924 = vmatprep.subr.bf16.mxu1 %v5609_v8  ;;  %v5624_v23 = vld [vmem:[#allocation2 + $0x10] sm:$0xff]   ;;  %v5625_v24 = vld [vmem:[#allocation2 + $0xc8] sm:$0xff]   ;;  %v5629_v28 = vld [vmem:[#allocation2 + $0xc0] sm:$0xff]  }
  0x16   :  { %4902 = vmatprep.subr.bf16.mxu0 %v5610_v9  ;;  %v5626_v25 = vld [vmem:[#allocation2 + $0x48] sm:$0xff]   ;;  %v5630_v29 = vld [vmem:[#allocation2 + $0x40] sm:$0xff]   ;;  %v5633_v47 = vld [vmem:[#allocation2 + $0x178] sm:$0xff]  }
  0x17   :  { %v5627_v26 = vld [vmem:[#allocation2 + $0x88] sm:$0xff]   ;;  %v5631_v30 = vld [vmem:[#allocation2 + $0x80] sm:$0xff]   ;;  %v5634_v54 = vld [vmem:[#allocation2 + $0x138] sm:$0xff]  }
  0x18   :  { %4925 = vmatpush3.bf16.msra.mxu1 %v5611_v10  ;;  %v5628_v27 = vld [vmem:[#allocation2 + $0x8] sm:$0xff]   ;;  %v5632_v31 = vld [vmem:[#allocation2] sm:$0xff]   ;;  %v5635_v55 = vld [vmem:[#allocation2 + $0x170] sm:$0xff]  }
  0x19   :  { %4903 = vmatpush3.bf16.msra.mxu0 %v5612_v11  ;;  %4926 = vmatprep.subr.bf16.mxu1 %v5613_v12  ;;  %v49_v32 = vld [vmem:[%s6441_s0 + $0x8] sm:$0x3f]  ;;  %v48_v33 = vld [vmem:[%s6441_s0] sm:$0x3f]  ;;  %v5636_v56 = vld [vmem:[#allocation2 + $0x130] sm:$0xff]  }
  0x1a   :  { %4904 = vmatprep.subr.bf16.mxu0 %v5614_v13  ;;  %v5893_v34 = vpack.c.bf16 %v49_v32, %v49_v32  ;;  %v5895_v35 = vpack.c.bf16 %v48_v33, %v48_v33  ;;  %v4586_v52 = vld [vmem:[%s6444_s3 + $0x4] sm:$0xf]  ;;  %v220_v53 = vld [vmem:[%s6444_s3] sm:$0xf]  ;;  %v5637_v57 = vld [vmem:[#allocation2 + $0x168] sm:$0xff]  }
  0x1b   :  { %v5638_v58 = vld [vmem:[#allocation2 + $0x128] sm:$0xff]   ;;  %v5639_v59 = vld [vmem:[#allocation2 + $0x160] sm:$0xff]   ;;  %v5641_v61 = vld [vmem:[#allocation2 + $0x158] sm:$0xff]  }
  0x1c   :  { %4927 = vmatpush3.bf16.msra.mxu1 %v5615_v14  ;;  %383 = vmatprep.mubr.bf16.mxu1 %v5893_v34  ;;  %v5640_v60 = vld [vmem:[#allocation2 + $0x120] sm:$0xff]   ;;  %v5642_v62 = vld [vmem:[#allocation2 + $0x118] sm:$0xff]   ;;  %v5643_v63 = vld [vmem:[#allocation2 + $0x150] sm:$0xff]  }
  0x1d   :  { %4905 = vmatpush3.bf16.msra.mxu0 %v5616_v15  ;;  %4928 = vmatprep.subr.bf16.mxu1 %v5617_v16  ;;  %v5644_v0 = vld [vmem:[#allocation2 + $0x110] sm:$0xff]   ;;  %v5645_v1 = vld [vmem:[#allocation2 + $0x148] sm:$0xff]   ;;  %v5647_v3 = vld [vmem:[#allocation2 + $0x140] sm:$0xff]  }
  0x1e   :  { %4906 = vmatprep.subr.bf16.mxu0 %v5618_v17  ;;  %212 = vmatprep.mubr.bf16.mxu0 %v5893_v34  ;;  %v5646_v2 = vld [vmem:[#allocation2 + $0x108] sm:$0xff]   ;;  %v5648_v4 = vld [vmem:[#allocation2 + $0x100] sm:$0xff]   ;;  %v5659_v32 = vld [vmem:[#allocation2 + $0x1d0] sm:$0xff]  }
  0x1f   :  { %v5660_v33 = vld [vmem:[#allocation2 + $0x190] sm:$0xff]  }
  0x20   :  { %4929 = vmatpush3.bf16.msra.mxu1 %v5619_v18 }
  0x21   :  { %4907 = vmatpush3.bf16.msra.mxu0 %v5620_v19  ;;  %4930 = vmatprep.subr.bf16.mxu1 %v5621_v20  ;;  %v5649_v19 = vld [vmem:[#allocation2 + $0x1f8] sm:$0xff]  }
  0x22   :  { %4908 = vmatprep.subr.bf16.mxu0 %v5622_v21 }
  0x24   :  { %4931 = vmatpush3.bf16.msra.mxu1 %v5623_v22  ;;  %v4605_v22 = vld [vmem:[%s6444_s3 + $0x8] sm:$0xf] }
  0x25   :  { %4909 = vmatpush3.bf16.msra.mxu0 %v5624_v23  ;;  %4932 = vmatprep.subr.bf16.mxu1 %v5625_v24  ;;  %v5650_v23 = vld [vmem:[#allocation2 + $0x1b8] sm:$0xff]   ;;  %v5651_v24 = vld [vmem:[#allocation2 + $0x1f0] sm:$0xff]  }
  0x26   :  { %4910 = vmatprep.subr.bf16.mxu0 %v5626_v25  ;;  %v5652_v25 = vld [vmem:[#allocation2 + $0x1b0] sm:$0xff]  }
  0x28   :  { %4933 = vmatpush3.bf16.msra.mxu1 %v5627_v26  ;;  %v5653_v26 = vld [vmem:[#allocation2 + $0x1e8] sm:$0xff]  }
  0x29   :  { %4911 = vmatpush3.bf16.msra.mxu0 %v5628_v27  ;;  %4934 = vmatprep.subr.bf16.mxu1 %v5629_v28  ;;  %v5654_v27 = vld [vmem:[#allocation2 + $0x1a8] sm:$0xff]   ;;  %v5655_v28 = vld [vmem:[#allocation2 + $0x1e0] sm:$0xff]  }
  0x2a   :  { %4912 = vmatprep.subr.bf16.mxu0 %v5630_v29  ;;  %v5656_v29 = vld [vmem:[#allocation2 + $0x1a0] sm:$0xff]  }
  0x2c   :  { %4935 = vmatpush3.bf16.msra.mxu1 %v5631_v30  ;;  %v5657_v30 = vld [vmem:[#allocation2 + $0x1d8] sm:$0xff]  }
  0x2d   :  { %4913 = vmatpush3.bf16.msra.mxu0 %v5632_v31  ;;  %5231 = vmatprep.subr.bf16.mxu1 %v5823_v36  ;;  %v5658_v31 = vld [vmem:[#allocation2 + $0x198] sm:$0xff]  }
  0x2e   :  { %5225 = vmatprep.subr.bf16.mxu0 %v5823_v36 }
  0x2f   :  { %384 = vmatmul.mubr.bf16.vlgmr.msra.gmra.mxu1 %v5895_v35 }
  0x30   :  { %213 = vmatmul.mubr.bf16.vlgmr.msra.gmra.mxu0 %v5895_v35  ;;  %5233 = vmatprep.mubr.msk.bf16.mxu1 %vm5824_vm0, %v5823_v36 }
  0x31   :  { %5227 = vmatprep.mubr.msk.bf16.mxu0 %vm5824_vm0, %v5823_v36 }
  0xef   :  { %v4936_v37 = vpop.f32.mrf.mxu1 }
  0xf0   :  { %v4914_v38 = vpop.f32.mrf.mxu0 }
  0xf1   :  { %v4937_v39 = vpop.f32.mrf.mxu1 }
  0xf2   :  { %v4915_v40 = vpop.f32.mrf.mxu0  ;;  %v4938_v41 = vadd.f32 %v4937_v39, %v4936_v37  ;;  %v5661_v37 = vld [vmem:[#allocation2 + $0x1c8] sm:$0xff]   ;;  %v5663_v39 = vld [vmem:[#allocation2 + $0x1c0] sm:$0xff]  }
  0xf3   :  { %v4916_v42 = vadd.f32 %v4915_v40, %v4914_v38  ;;  %v4939_v43 = vpop.f32.mrf.mxu1  ;;  %v5662_v38 = vld [vmem:[#allocation2 + $0x188] sm:$0xff]   ;;  %v5664_v40 = vld [vmem:[#allocation2 + $0x180] sm:$0xff]  }
  0xf4   :  { %v4917_v44 = vpop.f32.mrf.mxu0  ;;  %v393_v45 = vpack.c.bf16 %v4938_v41, %v4938_v41 }
  0xf5   :  { %v221_v46 = vpack.c.bf16 %v4916_v42, %v4916_v42  ;;  %v4940_v48 = vpop.f32.mrf.mxu1 }
  0xf6   :  { %v4918_v49 = vpop.f32.mrf.mxu0  ;;  %v400_v51 = vsel %vm398_vm1, %v393_v45, 0 }
  0xf7   :  { %v446_v50 = vsel %vm398_vm1, %v221_v46, 0  ;;  %5226 = vmatpush3.bf16.msra.mxu0 %v400_v51  ;;  %v5665_v51 = vld [vmem:[#allocation2 + $0x278] sm:$0xff]  }
  0xf8   :  { %5232 = vmatpush3.bf16.msra.mxu1 %v446_v50  ;;  %4946 = vmatprep.subr.bf16.mxu0 %v5633_v47 }
  0xf9   :  { %5237 = vmatprep.subr.bf16.mxu1 %v5823_v36 }
  0xfa   :  { %5228 = vmatmul.mubr.msk.bf16.vlgmr.msra.gmra.mxu0 %vm394_vm2, %v4586_v52 }
  0xfb   :  { %5234 = vmatmul.mubr.msk.bf16.vlgmr.msra.gmra.mxu1 %vm394_vm2, %v220_v53  ;;  %4947 = vmatpush3.bf16.msra.mxu0 %v5634_v54  ;;  %v4623_v54 = vld [vmem:[%s6444_s3 + $0xc] sm:$0xf] }
  0xfc   :  { %649 = vmatprep.mubr.bf16.mxu0 %v5893_v34  ;;  %4948 = vmatprep.subr.bf16.mxu0 %v5635_v55  ;;  %v5666_v55 = vld [vmem:[#allocation2 + $0x238] sm:$0xff]  }
  0xfd   :  { %5239 = vmatprep.mubr.msk.bf16.mxu1 %vm5824_vm0, %v5823_v36 }
  0xff   :  { %4949 = vmatpush3.bf16.msra.mxu0 %v5636_v56  ;;  %v5667_v56 = vld [vmem:[#allocation2 + $0x270] sm:$0xff]  }
 0x100   :  { %4950 = vmatprep.subr.bf16.mxu0 %v5637_v57  ;;  %v5668_v57 = vld [vmem:[#allocation2 + $0x230] sm:$0xff]  }
 0x103   :  { %4951 = vmatpush3.bf16.msra.mxu0 %v5638_v58  ;;  %v5669_v58 = vld [vmem:[#allocation2 + $0x268] sm:$0xff]  }
 0x104   :  { %4952 = vmatprep.subr.bf16.mxu0 %v5639_v59  ;;  %v5670_v59 = vld [vmem:[#allocation2 + $0x228] sm:$0xff]  }
 0x107   :  { %4953 = vmatpush3.bf16.msra.mxu0 %v5640_v60  ;;  %v5671_v60 = vld [vmem:[#allocation2 + $0x260] sm:$0xff]  }
 0x108   :  { %4954 = vmatprep.subr.bf16.mxu0 %v5641_v61  ;;  %v5672_v61 = vld [vmem:[#allocation2 + $0x220] sm:$0xff]  }
 0x10b   :  { %4955 = vmatpush3.bf16.msra.mxu0 %v5642_v62  ;;  %v5673_v62 = vld [vmem:[#allocation2 + $0x258] sm:$0xff]  }
 0x10c   :  { %4956 = vmatprep.subr.bf16.mxu0 %v5643_v63  ;;  %v5674_v63 = vld [vmem:[#allocation2 + $0x218] sm:$0xff]  }
 0x10f   :  { %4957 = vmatpush3.bf16.msra.mxu0 %v5644_v0  ;;  %v5675_v0 = vld [vmem:[#allocation2 + $0x250] sm:$0xff]  }
 0x110   :  { %4958 = vmatprep.subr.bf16.mxu0 %v5645_v1  ;;  %v5676_v1 = vld [vmem:[#allocation2 + $0x210] sm:$0xff]  }
 0x113   :  { %4959 = vmatpush3.bf16.msra.mxu0 %v5646_v2  ;;  %v5677_v2 = vld [vmem:[#allocation2 + $0x248] sm:$0xff]  }
 0x114   :  { %4960 = vmatprep.subr.bf16.mxu0 %v5647_v3  ;;  %v5678_v3 = vld [vmem:[#allocation2 + $0x208] sm:$0xff]  }
 0x117   :  { %4961 = vmatpush3.bf16.msra.mxu0 %v5648_v4  ;;  %v5679_v4 = vld [vmem:[#allocation2 + $0x240] sm:$0xff]  }
 0x118   :  { %5243 = vmatprep.subr.bf16.mxu0 %v5823_v36 }
 0x11a   :  { %650 = vmatmul.mubr.bf16.vlgmr.msra.gmra.mxu0 %v5895_v35 }
 0x11b   :  { %5245 = vmatprep.mubr.msk.bf16.mxu0 %vm5824_vm0, %v5823_v36 }
 0x1ba   :  { %v436_v5 = vpop.f32.mrf.mxu0 }
 0x1bb   :  { %v482_v6 = vpop.f32.mrf.mxu1 }
 0x1bc   :  { %v483_v7 = vadd.f32 %v482_v6, %v436_v5  ;;  %v5229_v8 = vpop.f32.mrf.mxu0  ;;  %v5680_v5 = vld [vmem:[#allocation2 + $0x200] sm:$0xff]  }
 0x1bd   :  { %v5235_v9 = vpop.f32.mrf.mxu1 }
 0x1be   :  { %v439_v10 = vpop.f32.mrf.mxu0 }
 0x1bf   :  { %v485_v11 = vpop.f32.mrf.mxu1 }
 0x1c0   :  { %v5230_v12 = vpop.f32.mrf.mxu0 }
 0x1c1   :  { %v5236_v13 = vpop.f32.mrf.mxu1 }
 0x1da   :  { %v4962_v14 = vpop.f32.mrf.mxu0 }
 0x1dc   :  { %v4963_v15 = vpop.f32.mrf.mxu0 }
 0x1dd   :  { %v4964_v16 = vadd.f32 %v4963_v15, %v4962_v14 }
 0x1de   :  { %v4965_v17 = vpop.f32.mrf.mxu0 }
 0x1df   :  { %v659_v18 = vpack.c.bf16 %v4964_v16, %v4964_v16  ;;  %v5681_v16 = vld [vmem:[#allocation2 + $0x2f8] sm:$0xff]  }
 0x1e0   :  { %v4966_v20 = vpop.f32.mrf.mxu0 }
 0x1e1   :  { %v664_v21 = vsel %vm398_vm1, %v659_v18, 0  ;;  %v5682_v20 = vld [vmem:[#allocation2 + $0x2b8] sm:$0xff]  }
 0x1e2   :  { %5238 = vmatpush3.bf16.msra.mxu1 %v664_v21  ;;  %v5683_v21 = vld [vmem:[#allocation2 + $0x2f0] sm:$0xff]  }
 0x1e3   :  { %4970 = vmatprep.subr.bf16.mxu1 %v5649_v19  ;;  %v4641_v19 = vld [vmem:[%s6444_s3 + $0x10] sm:$0xf] }
 0x1e5   :  { %5240 = vmatmul.mubr.msk.bf16.vlgmr.msra.gmra.mxu1 %vm394_vm2, %v4605_v22  ;;  %v5684_v22 = vld [vmem:[#allocation2 + $0x2b0] sm:$0xff]  }
 0x1e6   :  { %4971 = vmatpush3.bf16.msra.mxu1 %v5650_v23  ;;  %868 = vmatprep.mubr.bf16.mxu1 %v5893_v34  ;;  %v5685_v23 = vld [vmem:[#allocation2 + $0x2e8] sm:$0xff]  }
 0x1e7   :  { %4972 = vmatprep.subr.bf16.mxu1 %v5651_v24  ;;  %v5686_v24 = vld [vmem:[#allocation2 + $0x2a8] sm:$0xff]  }
 0x1ea   :  { %4973 = vmatpush3.bf16.msra.mxu1 %v5652_v25  ;;  %v5687_v25 = vld [vmem:[#allocation2 + $0x2e0] sm:$0xff]  }
 0x1eb   :  { %4974 = vmatprep.subr.bf16.mxu1 %v5653_v26  ;;  %v5688_v26 = vld [vmem:[#allocation2 + $0x2a0] sm:$0xff]  }
 0x1ee   :  { %4975 = vmatpush3.bf16.msra.mxu1 %v5654_v27  ;;  %v5689_v27 = vld [vmem:[#allocation2 + $0x2d8] sm:$0xff]  }
 0x1ef   :  { %4976 = vmatprep.subr.bf16.mxu1 %v5655_v28  ;;  %v5690_v28 = vld [vmem:[#allocation2 + $0x298] sm:$0xff]  }
 0x1f2   :  { %4977 = vmatpush3.bf16.msra.mxu1 %v5656_v29  ;;  %v5691_v29 = vld [vmem:[#allocation2 + $0x2d0] sm:$0xff]  }
 0x1f3   :  { %4978 = vmatprep.subr.bf16.mxu1 %v5657_v30  ;;  %v5692_v30 = vld [vmem:[#allocation2 + $0x290] sm:$0xff]  }
 0x1f6   :  { %4979 = vmatpush3.bf16.msra.mxu1 %v5658_v31  ;;  %v5693_v31 = vld [vmem:[#allocation2 + $0x2c8] sm:$0xff]  }
 0x1f7   :  { %4980 = vmatprep.subr.bf16.mxu1 %v5659_v32  ;;  %v5694_v32 = vld [vmem:[#allocation2 + $0x288] sm:$0xff]  }
 0x1fa   :  { %4981 = vmatpush3.bf16.msra.mxu1 %v5660_v33  ;;  %v5695_v33 = vld [vmem:[#allocation2 + $0x2c0] sm:$0xff]  }
 0x1fb   :  { %4982 = vmatprep.subr.bf16.mxu1 %v5661_v37  ;;  %v5696_v37 = vld [vmem:[#allocation2 + $0x280] sm:$0xff]  }
 0x1fe   :  { %4983 = vmatpush3.bf16.msra.mxu1 %v5662_v38 }
 0x1ff   :  { %4984 = vmatprep.subr.bf16.mxu1 %v5663_v39 }
 0x202   :  { %4985 = vmatpush3.bf16.msra.mxu1 %v5664_v40 }
 0x203   :  { %5249 = vmatprep.subr.bf16.mxu1 %v5823_v36 }
 0x205   :  { %869 = vmatmul.mubr.bf16.vlgmr.msra.gmra.mxu1 %v5895_v35 }
 0x206   :  { %5251 = vmatprep.mubr.msk.bf16.mxu1 %vm5824_vm0, %v5823_v36 }
 0x2a5   :  { %v700_v41 = vpop.f32.mrf.mxu1 }
 0x2a6   :  { %v706_v42 = vadd.f32 %v700_v41, %v483_v7 }
 0x2a7   :  { %v5241_v43 = vpop.f32.mrf.mxu1 }
 0x2a9   :  { %v703_v44 = vpop.f32.mrf.mxu1 }
 0x2ab   :  { %v5242_v45 = vpop.f32.mrf.mxu1 }
 0x2c5   :  { %v4986_v46 = vpop.f32.mrf.mxu1 }
 0x2c7   :  { %v4987_v47 = vpop.f32.mrf.mxu1 }
 0x2c8   :  { %v4988_v48 = vadd.f32 %v4987_v47, %v4986_v46 }
 0x2c9   :  { %v4989_v49 = vpop.f32.mrf.mxu1 }
 0x2ca   :  { %v878_v50 = vpack.c.bf16 %v4988_v48, %v4988_v48  ;;  %v5697_v48 = vld [vmem:[#allocation2 + $0x378] sm:$0xff]  }
 0x2cb   :  { %v4990_v52 = vpop.f32.mrf.mxu1 }
 0x2cc   :  { %v883_v53 = vsel %vm398_vm1, %v878_v50, 0  ;;  %v5698_v52 = vld [vmem:[#allocation2 + $0x338] sm:$0xff]  }
 0x2cd   :  { %5244 = vmatpush3.bf16.msra.mxu0 %v883_v53  ;;  %v5699_v53 = vld [vmem:[#allocation2 + $0x370] sm:$0xff]  }
 0x2ce   :  { %4994 = vmatprep.subr.bf16.mxu0 %v5665_v51  ;;  %v4659_v51 = vld [vmem:[%s6444_s3 + $0x14] sm:$0xf] }
 0x2d0   :  { %5246 = vmatmul.mubr.msk.bf16.vlgmr.msra.gmra.mxu0 %vm394_vm2, %v4623_v54  ;;  %v5700_v54 = vld [vmem:[#allocation2 + $0x330] sm:$0xff]  }
 0x2d1   :  { %4995 = vmatpush3.bf16.msra.mxu0 %v5666_v55  ;;  %1087 = vmatprep.mubr.bf16.mxu0 %v5893_v34  ;;  %v5701_v55 = vld [vmem:[#allocation2 + $0x368] sm:$0xff]  }
 0x2d2   :  { %4996 = vmatprep.subr.bf16.mxu0 %v5667_v56  ;;  %v5702_v56 = vld [vmem:[#allocation2 + $0x328] sm:$0xff]  }
 0x2d5   :  { %4997 = vmatpush3.bf16.msra.mxu0 %v5668_v57  ;;  %v5703_v57 = vld [vmem:[#allocation2 + $0x360] sm:$0xff]  }
 0x2d6   :  { %4998 = vmatprep.subr.bf16.mxu0 %v5669_v58  ;;  %v5704_v58 = vld [vmem:[#allocation2 + $0x320] sm:$0xff]  }
 0x2d9   :  { %4999 = vmatpush3.bf16.msra.mxu0 %v5670_v59  ;;  %v5705_v59 = vld [vmem:[#allocation2 + $0x358] sm:$0xff]  }
 0x2da   :  { %5000 = vmatprep.subr.bf16.mxu0 %v5671_v60  ;;  %v5706_v60 = vld [vmem:[#allocation2 + $0x318] sm:$0xff]  }
 0x2dd   :  { %5001 = vmatpush3.bf16.msra.mxu0 %v5672_v61  ;;  %v5707_v61 = vld [vmem:[#allocation2 + $0x350] sm:$0xff]  }
 0x2de   :  { %5002 = vmatprep.subr.bf16.mxu0 %v5673_v62  ;;  %v5708_v62 = vld [vmem:[#allocation2 + $0x310] sm:$0xff]  }
 0x2e1   :  { %5003 = vmatpush3.bf16.msra.mxu0 %v5674_v63  ;;  %v5709_v63 = vld [vmem:[#allocation2 + $0x348] sm:$0xff]  }
 0x2e2   :  { %5004 = vmatprep.subr.bf16.mxu0 %v5675_v0  ;;  %v5710_v0 = vld [vmem:[#allocation2 + $0x308] sm:$0xff]  }
 0x2e5   :  { %5005 = vmatpush3.bf16.msra.mxu0 %v5676_v1  ;;  %v5711_v1 = vld [vmem:[#allocation2 + $0x340] sm:$0xff]  }
 0x2e6   :  { %5006 = vmatprep.subr.bf16.mxu0 %v5677_v2  ;;  %v5712_v2 = vld [vmem:[#allocation2 + $0x300] sm:$0xff]  }
 0x2e9   :  { %5007 = vmatpush3.bf16.msra.mxu0 %v5678_v3 }
 0x2ea   :  { %5008 = vmatprep.subr.bf16.mxu0 %v5679_v4 }
 0x2ed   :  { %5009 = vmatpush3.bf16.msra.mxu0 %v5680_v5 }
 0x2ee   :  { %5255 = vmatprep.subr.bf16.mxu0 %v5823_v36 }
 0x2f0   :  { %1088 = vmatmul.mubr.bf16.vlgmr.msra.gmra.mxu0 %v5895_v35 }
 0x2f1   :  { %5257 = vmatprep.mubr.msk.bf16.mxu0 %vm5824_vm0, %v5823_v36 }
 0x390   :  { %v919_v6 = vpop.f32.mrf.mxu0 }
 0x391   :  { %v925_v7 = vadd.f32 %v919_v6, %v706_v42 }
 0x392   :  { %v5247_v8 = vpop.f32.mrf.mxu0 }
 0x394   :  { %v922_v9 = vpop.f32.mrf.mxu0 }
 0x396   :  { %v5248_v10 = vpop.f32.mrf.mxu0 }
 0x3b0   :  { %v5010_v11 = vpop.f32.mrf.mxu0 }
 0x3b2   :  { %v5011_v12 = vpop.f32.mrf.mxu0 }
 0x3b3   :  { %v5012_v13 = vadd.f32 %v5011_v12, %v5010_v11 }
 0x3b4   :  { %v5013_v14 = vpop.f32.mrf.mxu0 }
 0x3b5   :  { %v1097_v15 = vpack.c.bf16 %v5012_v13, %v5012_v13  ;;  %v5713_v13 = vld [vmem:[#allocation2 + $0x3f8] sm:$0xff]  }
 0x3b6   :  { %v5014_v17 = vpop.f32.mrf.mxu0 }
 0x3b7   :  { %v1102_v18 = vsel %vm398_vm1, %v1097_v15, 0  ;;  %v5714_v17 = vld [vmem:[#allocation2 + $0x3b8] sm:$0xff]  }
 0x3b8   :  { %5250 = vmatpush3.bf16.msra.mxu1 %v1102_v18  ;;  %v5715_v18 = vld [vmem:[#allocation2 + $0x3f0] sm:$0xff]  }
 0x3b9   :  { %5018 = vmatprep.subr.bf16.mxu1 %v5681_v16  ;;  %v4677_v16 = vld [vmem:[%s6444_s3 + $0x18] sm:$0xf] }
 0x3bb   :  { %5252 = vmatmul.mubr.msk.bf16.vlgmr.msra.gmra.mxu1 %vm394_vm2, %v4641_v19  ;;  %v5716_v19 = vld [vmem:[#allocation2 + $0x3b0] sm:$0xff]  }
 0x3bc   :  { %5019 = vmatpush3.bf16.msra.mxu1 %v5682_v20  ;;  %1306 = vmatprep.mubr.bf16.mxu1 %v5893_v34  ;;  %v5717_v20 = vld [vmem:[#allocation2 + $0x3e8] sm:$0xff]  }
 0x3bd   :  { %5020 = vmatprep.subr.bf16.mxu1 %v5683_v21  ;;  %v5718_v21 = vld [vmem:[#allocation2 + $0x3a8] sm:$0xff]  }
 0x3c0   :  { %5021 = vmatpush3.bf16.msra.mxu1 %v5684_v22  ;;  %v5719_v22 = vld [vmem:[#allocation2 + $0x3e0] sm:$0xff]  }
 0x3c1   :  { %5022 = vmatprep.subr.bf16.mxu1 %v5685_v23  ;;  %v5720_v23 = vld [vmem:[#allocation2 + $0x3a0] sm:$0xff]  }
 0x3c4   :  { %5023 = vmatpush3.bf16.msra.mxu1 %v5686_v24  ;;  %v5721_v24 = vld [vmem:[#allocation2 + $0x3d8] sm:$0xff]  }
 0x3c5   :  { %5024 = vmatprep.subr.bf16.mxu1 %v5687_v25  ;;  %v5722_v25 = vld [vmem:[#allocation2 + $0x398] sm:$0xff]  }
 0x3c8   :  { %5025 = vmatpush3.bf16.msra.mxu1 %v5688_v26  ;;  %v5723_v26 = vld [vmem:[#allocation2 + $0x3d0] sm:$0xff]  }
 0x3c9   :  { %5026 = vmatprep.subr.bf16.mxu1 %v5689_v27  ;;  %v5724_v27 = vld [vmem:[#allocation2 + $0x390] sm:$0xff]  }
 0x3cc   :  { %5027 = vmatpush3.bf16.msra.mxu1 %v5690_v28  ;;  %v5725_v28 = vld [vmem:[#allocation2 + $0x3c8] sm:$0xff]  }
 0x3cd   :  { %5028 = vmatprep.subr.bf16.mxu1 %v5691_v29  ;;  %v5726_v29 = vld [vmem:[#allocation2 + $0x388] sm:$0xff]  }
 0x3d0   :  { %5029 = vmatpush3.bf16.msra.mxu1 %v5692_v30  ;;  %v5727_v30 = vld [vmem:[#allocation2 + $0x3c0] sm:$0xff]  }
 0x3d1   :  { %5030 = vmatprep.subr.bf16.mxu1 %v5693_v31  ;;  %v5728_v31 = vld [vmem:[#allocation2 + $0x380] sm:$0xff]  }
 0x3d4   :  { %5031 = vmatpush3.bf16.msra.mxu1 %v5694_v32 }
 0x3d5   :  { %5032 = vmatprep.subr.bf16.mxu1 %v5695_v33 }
 0x3d8   :  { %5033 = vmatpush3.bf16.msra.mxu1 %v5696_v37 }
 0x3d9   :  { %5261 = vmatprep.subr.bf16.mxu1 %v5823_v36 }
 0x3db   :  { %1307 = vmatmul.mubr.bf16.vlgmr.msra.gmra.mxu1 %v5895_v35 }
 0x3dc   :  { %5263 = vmatprep.mubr.msk.bf16.mxu1 %vm5824_vm0, %v5823_v36 }
 0x47b   :  { %v1138_v38 = vpop.f32.mrf.mxu1 }
 0x47c   :  { %v1144_v39 = vadd.f32 %v1138_v38, %v925_v7 }
 0x47d   :  { %v5253_v40 = vpop.f32.mrf.mxu1 }
 0x47f   :  { %v1141_v41 = vpop.f32.mrf.mxu1 }
 0x481   :  { %v5254_v42 = vpop.f32.mrf.mxu1 }
 0x49b   :  { %v5034_v43 = vpop.f32.mrf.mxu1 }
 0x49d   :  { %v5035_v44 = vpop.f32.mrf.mxu1 }
 0x49e   :  { %v5036_v45 = vadd.f32 %v5035_v44, %v5034_v43 }
 0x49f   :  { %v5037_v46 = vpop.f32.mrf.mxu1 }
 0x4a0   :  { %v1316_v47 = vpack.c.bf16 %v5036_v45, %v5036_v45  ;;  %v5729_v45 = vld [vmem:[#allocation2 + $0x478] sm:$0xff]  }
 0x4a1   :  { %v5038_v49 = vpop.f32.mrf.mxu1 }
 0x4a2   :  { %v1321_v50 = vsel %vm398_vm1, %v1316_v47, 0  ;;  %v5730_v49 = vld [vmem:[#allocation2 + $0x438] sm:$0xff]  }
 0x4a3   :  { %5256 = vmatpush3.bf16.msra.mxu0 %v1321_v50  ;;  %v5731_v50 = vld [vmem:[#allocation2 + $0x470] sm:$0xff]  }
 0x4a4   :  { %5042 = vmatprep.subr.bf16.mxu0 %v5697_v48  ;;  %v4695_v48 = vld [vmem:[%s6444_s3 + $0x1c] sm:$0xf] }
 0x4a6   :  { %5258 = vmatmul.mubr.msk.bf16.vlgmr.msra.gmra.mxu0 %vm394_vm2, %v4659_v51  ;;  %v5732_v51 = vld [vmem:[#allocation2 + $0x430] sm:$0xff]  }
 0x4a7   :  { %5043 = vmatpush3.bf16.msra.mxu0 %v5698_v52  ;;  %1525 = vmatprep.mubr.bf16.mxu0 %v5893_v34  ;;  %v5733_v52 = vld [vmem:[#allocation2 + $0x468] sm:$0xff]  }
 0x4a8   :  { %5044 = vmatprep.subr.bf16.mxu0 %v5699_v53  ;;  %v5734_v53 = vld [vmem:[#allocation2 + $0x428] sm:$0xff]  }
 0x4ab   :  { %5045 = vmatpush3.bf16.msra.mxu0 %v5700_v54  ;;  %v5735_v54 = vld [vmem:[#allocation2 + $0x460] sm:$0xff]  }
 0x4ac   :  { %5046 = vmatprep.subr.bf16.mxu0 %v5701_v55  ;;  %v5736_v55 = vld [vmem:[#allocation2 + $0x420] sm:$0xff]  }
 0x4af   :  { %5047 = vmatpush3.bf16.msra.mxu0 %v5702_v56  ;;  %v5737_v56 = vld [vmem:[#allocation2 + $0x458] sm:$0xff]  }
 0x4b0   :  { %5048 = vmatprep.subr.bf16.mxu0 %v5703_v57  ;;  %v5738_v57 = vld [vmem:[#allocation2 + $0x418] sm:$0xff]  }
 0x4b3   :  { %5049 = vmatpush3.bf16.msra.mxu0 %v5704_v58  ;;  %v5739_v58 = vld [vmem:[#allocation2 + $0x450] sm:$0xff]  }
 0x4b4   :  { %5050 = vmatprep.subr.bf16.mxu0 %v5705_v59  ;;  %v5740_v59 = vld [vmem:[#allocation2 + $0x410] sm:$0xff]  }
 0x4b7   :  { %5051 = vmatpush3.bf16.msra.mxu0 %v5706_v60  ;;  %v5741_v60 = vld [vmem:[#allocation2 + $0x448] sm:$0xff]  }
 0x4b8   :  { %5052 = vmatprep.subr.bf16.mxu0 %v5707_v61  ;;  %v5743_v61 = vld [vmem:[#allocation2 + $0x440] sm:$0xff]  }
 0x4bb   :  { %5053 = vmatpush3.bf16.msra.mxu0 %v5708_v62  ;;  %v5744_v62 = vld [vmem:[#allocation2 + $0x400] sm:$0xff]  }
 0x4bc   :  { %5054 = vmatprep.subr.bf16.mxu0 %v5709_v63 }
 0x4bf   :  { %5055 = vmatpush3.bf16.msra.mxu0 %v5710_v0 }
 0x4c0   :  { %5056 = vmatprep.subr.bf16.mxu0 %v5711_v1 }
 0x4c3   :  { %5057 = vmatpush3.bf16.msra.mxu0 %v5712_v2 }
 0x4c4   :  { %5267 = vmatprep.subr.bf16.mxu0 %v5823_v36 }
 0x4c6   :  { %1526 = vmatmul.mubr.bf16.vlgmr.msra.gmra.mxu0 %v5895_v35 }
 0x4c7   :  { %5269 = vmatprep.mubr.msk.bf16.mxu0 %vm5824_vm0, %v5823_v36 }
 0x566   :  { %v1357_v3 = vpop.f32.mrf.mxu0 }
 0x567   :  { %v1363_v4 = vadd.f32 %v1357_v3, %v1144_v39 }
 0x568   :  { %v5259_v5 = vpop.f32.mrf.mxu0 }
 0x56a   :  { %v1360_v6 = vpop.f32.mrf.mxu0 }
 0x56c   :  { %v5260_v7 = vpop.f32.mrf.mxu0 }
 0x586   :  { %v5058_v8 = vpop.f32.mrf.mxu0 }
 0x588   :  { %v5059_v9 = vpop.f32.mrf.mxu0 }
 0x589   :  { %v5060_v10 = vadd.f32 %v5059_v9, %v5058_v8 }
 0x58a   :  { %v5061_v11 = vpop.f32.mrf.mxu0 }
 0x58b   :  { %v1535_v12 = vpack.c.bf16 %v5060_v10, %v5060_v10 }
 0x58c   :  { %v5062_v14 = vpop.f32.mrf.mxu0 }
 0x58d   :  { %v1540_v15 = vsel %vm398_vm1, %v1535_v12, 0 }
 0x58e   :  { %5262 = vmatpush3.bf16.msra.mxu1 %v1540_v15 }
 0x58f   :  { %5066 = vmatprep.subr.bf16.mxu1 %v5713_v13 }
 0x591   :  { %5264 = vmatmul.mubr.msk.bf16.vlgmr.msra.gmra.mxu1 %vm394_vm2, %v4677_v16 }
 0x592   :  { %5067 = vmatpush3.bf16.msra.mxu1 %v5714_v17  ;;  %1744 = vmatprep.mubr.bf16.mxu1 %v5893_v34  ;;  %v5997_v17 = vld [vmem:[%s6443_s2] sm:$0xff] }
 0x593   :  { %5068 = vmatprep.subr.bf16.mxu1 %v5715_v18 }
 0x596   :  { %5069 = vmatpush3.bf16.msra.mxu1 %v5716_v19  ;;  %v5825_v19 = vmov 0  }
 0x597   :  { %5070 = vmatprep.subr.bf16.mxu1 %v5717_v20  ;;  %5592 = vset.pattern.permute.xlu0 %v5825_v19 }
 0x598   :  { %5593 = vset.pattern.permute.xlu1 %v5825_v19 }
 0x59a   :  { %5071 = vmatpush3.bf16.msra.mxu1 %v5718_v21 }
 0x59b   :  { %5072 = vmatprep.subr.bf16.mxu1 %v5719_v22 }
 0x59e   :  { %5073 = vmatpush3.bf16.msra.mxu1 %v5720_v23 }
 0x59f   :  { %5074 = vmatprep.subr.bf16.mxu1 %v5721_v24 }
 0x5a2   :  { %5075 = vmatpush3.bf16.msra.mxu1 %v5722_v25 }
 0x5a3   :  { %5076 = vmatprep.subr.bf16.mxu1 %v5723_v26 }
 0x5a6   :  { %5077 = vmatpush3.bf16.msra.mxu1 %v5724_v27 }
 0x5a7   :  { %5078 = vmatprep.subr.bf16.mxu1 %v5725_v28  ;;  %v5745_v28 = vld [vmem:[%s6447_s6 + $0x38] sm:$0xff]  }
 0x5aa   :  { %5079 = vmatpush3.bf16.msra.mxu1 %v5726_v29  ;;  %v5746_v29 = vld [vmem:[%s6447_s6 + $0x18] sm:$0xff]  }
 0x5ab   :  { %5080 = vmatprep.subr.bf16.mxu1 %v5727_v30  ;;  %v5747_v30 = vld [vmem:[%s6447_s6 + $0x30] sm:$0xff]  }
 0x5ae   :  { %5081 = vmatpush3.bf16.msra.mxu1 %v5728_v31 }
 0x5af   :  { %5273 = vmatprep.subr.bf16.mxu1 %v5823_v36 }
 0x5b1   :  { %1745 = vmatmul.mubr.bf16.vlgmr.msra.gmra.mxu1 %v5895_v35 }
 0x5b2   :  { %5275 = vmatprep.mubr.msk.bf16.mxu1 %vm5824_vm0, %v5823_v36 }
 0x651   :  { %v1576_v32 = vpop.f32.mrf.mxu1 }
 0x652   :  { %v1582_v33 = vadd.f32 %v1576_v32, %v1363_v4 }
 0x653   :  { %v5265_v37 = vpop.f32.mrf.mxu1 }
 0x655   :  { %v1579_v38 = vpop.f32.mrf.mxu1 }
 0x656   :  { %v5748_v38 = vld [vmem:[%s6447_s6 + $0x10] sm:$0xff]  }
 0x657   :  { %v5266_v39 = vpop.f32.mrf.mxu1 }
 0x658   :  { %v6030_v39 = vld [vmem:[%s6442_s1] sm:$0xff] }
 0x671   :  { %v5082_v40 = vpop.f32.mrf.mxu1 }
 0x673   :  { %v5083_v41 = vpop.f32.mrf.mxu1 }
 0x674   :  { %v5084_v42 = vadd.f32 %v5083_v41, %v5082_v40  ;;  %v5749_v40 = vld [vmem:[%s6447_s6 + $0x28] sm:$0xff]  }
 0x675   :  { %v5085_v43 = vpop.f32.mrf.mxu1  ;;  %v5750_v41 = vld [vmem:[%s6447_s6 + $0x8] sm:$0xff]  }
 0x676   :  { %v1754_v44 = vpack.c.bf16 %v5084_v42, %v5084_v42 }
 0x677   :  { %v5086_v46 = vpop.f32.mrf.mxu1 }
 0x678   :  { %v1759_v47 = vsel %vm398_vm1, %v1754_v44, 0  ;;  %v5751_v44 = vld [vmem:[%s6447_s6 + $0x20] sm:$0xff]   ;;  %v5826_v46 = vmov 1  }
 0x679   :  { %5268 = vmatpush3.bf16.msra.mxu0 %v1759_v47 }
 0x67a   :  { %5090 = vmatprep.subr.bf16.mxu0 %v5729_v45  ;;  %v5752_v45 = vld [vmem:[%s6447_s6] sm:$0xff]  }
 0x67c   :  { %5270 = vmatmul.mubr.msk.bf16.vlgmr.msra.gmra.mxu0 %vm394_vm2, %v4695_v48 }
 0x67d   :  { %5091 = vmatpush3.bf16.msra.mxu0 %v5730_v49  ;;  %1963 = vmatprep.mubr.bf16.mxu0 %v5893_v34  ;;  %v5742_v34 = vld [vmem:[#allocation2 + $0x408] sm:$0xff]  }
 0x67e   :  { %5092 = vmatprep.subr.bf16.mxu0 %v5731_v50 }
 0x681   :  { %5093 = vmatpush3.bf16.msra.mxu0 %v5732_v51 }
 0x682   :  { %5094 = vmatprep.subr.bf16.mxu0 %v5733_v52  ;;  %v5753_v52 = vld [vmem:[%s6447_s6 + $0x58] sm:$0xff]  }
 0x685   :  { %5095 = vmatpush3.bf16.msra.mxu0 %v5734_v53 }
 0x686   :  { %5096 = vmatprep.subr.bf16.mxu0 %v5735_v54  ;;  %v5754_v54 = vld [vmem:[%s6447_s6 + $0x50] sm:$0xff]  }
 0x689   :  { %5097 = vmatpush3.bf16.msra.mxu0 %v5736_v55  ;;  %v5755_v55 = vld [vmem:[%s6447_s6 + $0x48] sm:$0xff]  }
 0x68a   :  { %5098 = vmatprep.subr.bf16.mxu0 %v5737_v56  ;;  %v5756_v56 = vld [vmem:[%s6447_s6 + $0x40] sm:$0xff]  }
 0x68d   :  { %5099 = vmatpush3.bf16.msra.mxu0 %v5738_v57 }
 0x68e   :  { %5100 = vmatprep.subr.bf16.mxu0 %v5739_v58 }
 0x691   :  { %5101 = vmatpush3.bf16.msra.mxu0 %v5740_v59 }
 0x692   :  { %5102 = vmatprep.subr.bf16.mxu0 %v5741_v60 }
 0x695   :  { %5103 = vmatpush3.bf16.msra.mxu0 %v5742_v34 }
 0x696   :  { %5104 = vmatprep.subr.bf16.mxu0 %v5743_v61 }
 0x699   :  { %5105 = vmatpush3.bf16.msra.mxu0 %v5744_v62 }
 0x69a   :  { %5301 = vmatprep.subr.bf16.mxu0 %v5823_v36 }
 0x69c   :  { %1964 = vmatmul.mubr.bf16.vlgmr.msra.gmra.mxu0 %v5895_v35  ;;  %v4713_v35 = vld [vmem:[%s6444_s3 + $0x20] sm:$0xf] }
 0x69d   :  { %5309 = vmatprep.mubr.msk.bf16.mxu0 %vm5824_vm0, %v5823_v36  ;;  %5302 = vmatpush3.bf16.msra.mxu0 %v5745_v28 }
 0x69e   :  { %5303 = vmatprep.subr.bf16.mxu0 %v5823_v36 }
 0x6a1   :  { %5304 = vmatpush3.bf16.msra.mxu0 %v5747_v30 }
 0x6a2   :  { %5305 = vmatprep.subr.bf16.mxu0 %v5823_v36 }
 0x6a5   :  { %5306 = vmatpush3.bf16.msra.mxu0 %v5749_v40 }
 0x6a6   :  { %5307 = vmatprep.subr.bf16.mxu0 %v5823_v36 }
 0x6a9   :  { %5308 = vmatpush3.bf16.msra.mxu0 %v5751_v44  ;;  %v5762_v44 = vld [vmem:[%s6447_s6 + $0x90] sm:$0xff]  }
 0x6aa   :  { %5325 = vmatprep.subr.bf16.mxu0 %v5823_v36 }
 0x73c   :  { %v1795_v63 = vpop.f32.mrf.mxu0 }
 0x73d   :  { %v1801_v0 = vadd.f32 %v1795_v63, %v1582_v33 }
 0x73e   :  { %v5271_v1 = vpop.f32.mrf.mxu0 }
 0x73f   :  { %v4735_v1 = vld [vmem:[%s6446_s5 + $0x4] sm:$0xf] }
 0x740   :  { %v1798_v2 = vpop.f32.mrf.mxu0 }
 0x742   :  { %v5272_v3 = vpop.f32.mrf.mxu0 }
 0x75c   :  { %v5106_v4 = vpop.f32.mrf.mxu0 }
 0x75e   :  { %v5107_v5 = vpop.f32.mrf.mxu0 }
 0x75f   :  { %v5108_v6 = vadd.f32 %v5107_v5, %v5106_v4  ;;  %v2274_v5 = vld [vmem:[%s6446_s5] sm:$0xf] }
 0x760   :  { %v5109_v7 = vpop.f32.mrf.mxu0 }
 0x761   :  { %v1973_v8 = vpack.c.bf16 %v5108_v6, %v5108_v6 }
 0x762   :  { %v5110_v9 = vpop.f32.mrf.mxu0 }
 0x763   :  { %v1978_v10 = vsel %vm398_vm1, %v1973_v8, 0 }
 0x764   :  { %5274 = vmatpush3.bf16.msra.mxu1 %v1978_v10 }
 0x765   :  { %5279 = vmatprep.subr.mxu1 %v5823_v36 }
 0x767   :  { %5276 = vmatmul.mubr.msk.bf16.vlgmr.msra.gmra.mxu1 %vm394_vm2, %v4713_v35  ;;  %v4751_v35 = vld [vmem:[%s6446_s5 + $0x8] sm:$0xf] }
 0x768   :  { %5281 = vmatprep.mubr.msk.f32.mxu1 %vm5824_vm0, %v5823_v36 }
 0x827   :  { %v2014_v11 = vpop.f32.mrf.mxu1 }
 0x828   :  { %v2020_v12 = vadd.f32 %v2014_v11, %v1801_v0  ;;  %v5757_v11 = vld [vmem:[%s6447_s6 + $0x78] sm:$0xff]  }
 0x829   :  { %v5277_v13 = vpop.f32.mrf.mxu1 }
 0x82a   :  { %v2022_v14 = vsel %vm2021_vm3, %v2020_v12, 0.0  ;;  %v5758_v13 = vld [vmem:[%s6447_s6 + $0x70] sm:$0xff]  }
 0x82b   :  { %2023 = vadd.xlane.f32.xlu0 %v2022_v14  ;;  %v2017_v15 = vpop.f32.mrf.mxu1  ;;  %v5759_v14 = vld [vmem:[%s6447_s6 + $0x68] sm:$0xff]  }
 0x82c   :  { %v5760_v15 = vld [vmem:[%s6447_s6 + $0x60] sm:$0xff]  }
 0x82d   :  { %v5278_v16 = vpop.f32.mrf.mxu1 }
 0x8b4   :  { %v2024_v18 = vpop.xlane.xlu0 %2023 }
 0x8b5   :  { %5280 = vmatpush3.msra.mxu1 %v2024_v18 }
 0x8b6   :  { %5282 = vmatmul.mubr.msk.f32.vlgmr.msra.gmra.mxu1 %vm2025_vm4, %v5997_v17  ;;  %5284 = vmatprep.subr.mxu1 %v5823_v36 }
 0x8b7   :  { %5286 = vmatprep.mubr.msk.f32.mxu1 %vm5824_vm0, %v5823_v36 }
 0x976   :  { %v2095_v20 = vpop.f32.mrf.mxu1 }
 0x977   :  { %v2099_v21 = vmul.f32 0.0078125, %v2095_v20 }
 0x978   :  { %v5283_v22 = vpop.f32.mrf.mxu1 }
 0x979   :  { %2102 = vperm.xlu0 %5592, %v2099_v21  }
 0x9f4   :  { %v2103_v23 = vpop.permute.xlu0 %2102 }
 0x9f5   :  { %v2105_v24 = vsub.f32 %v2020_v12, %v2103_v23 }
 0x9f7   :  { %v2106_v25 = vmul.f32 %v2105_v24, %v2105_v24 }
 0x9f9   :  { %v2107_v26 = vsel %vm2021_vm3, %v2106_v25, 0.0 }
 0x9fa   :  { %2108 = vadd.xlane.f32.xlu1 %v2107_v26 }
 0xa83   :  { %v2109_v27 = vpop.xlane.xlu1 %2108 }
 0xa84   :  { %5285 = vmatpush3.msra.mxu1 %v2109_v27 }
 0xa85   :  { %5287 = vmatmul.mubr.msk.f32.vlgmr.msra.gmra.mxu1 %vm2025_vm4, %v5997_v17  ;;  %5289 = vmatprep.subr.bf16.mxu1 %v5823_v36 }
 0xa86   :  { %5297 = vmatprep.mubr.msk.bf16.mxu1 %vm5824_vm0, %v5823_v36  ;;  %5290 = vmatpush3.bf16.msra.mxu1 %v5746_v29 }
 0xa87   :  { %5291 = vmatprep.subr.bf16.mxu1 %v5823_v36 }
 0xa8a   :  { %5292 = vmatpush3.bf16.msra.mxu1 %v5748_v38 }
 0xa8b   :  { %5293 = vmatprep.subr.bf16.mxu1 %v5823_v36 }
 0xa8e   :  { %5294 = vmatpush3.bf16.msra.mxu1 %v5750_v41  ;;  %v4766_v41 = vld [vmem:[%s6446_s5 + $0xc] sm:$0xf] }
 0xa8f   :  { %5295 = vmatprep.subr.bf16.mxu1 %v5823_v36 }
 0xa92   :  { %5296 = vmatpush3.bf16.msra.mxu1 %v5752_v45  ;;  %v5763_v45 = vld [vmem:[%s6447_s6 + $0x88] sm:$0xff]  }
 0xa93   :  { %5313 = vmatprep.subr.bf16.mxu1 %v5823_v36 }
 0xb45   :  { %v2176_v31 = vpop.f32.mrf.mxu1 }
 0xb46   :  { %v2180_v32 = vmul.f32 0.0078125, %v2176_v31 }
 0xb47   :  { %v5288_v33 = vpop.f32.mrf.mxu1 }
 0xb48   :  { %v2182_v37 = vadd.f32 1e-05, %v2180_v32 }
 0xb4a   :  { %5790 = vrsqrt.f32 %v2182_v37 }
 0xb57   :  { %v5791_v42 = vpop.eup %5790 }
 0xb58   :  { %v2184_v43 = vmul.f32 %v5791_v42, %v6030_v39  ;;  %v5761_v42 = vld [vmem:[%s6447_s6 + $0x98] sm:$0xff]  }
 0xb5a   :  { %2187 = vperm.xlu1 %5593, %v2184_v43  }
 0xb5e   :  { %5594 = vset.pattern.permute.xlu1 %v5826_v46  ;;  %v5764_v46 = vld [vmem:[%s6447_s6 + $0x80] sm:$0xff]  }
 0xb5f   :  { %2193 = vperm.xlu1 %5594, %v6030_v39  }
 0xbd5   :  { %v2188_v47 = vpop.permute.xlu1 %2187 }
 0xbd6   :  { %v2190_v48 = vmul.f32 %v2188_v47, %v2105_v24 }
 0xbda   :  { %v2194_v49 = vpop.permute.xlu1 %2193 }
 0xbdb   :  { %v2196_v50 = vadd.f32 %v2194_v49, %v2190_v48 }
 0xbdd   :  { %v2197_v51 = vmax.f32 %v2196_v50, 0.0 }
 0xbdf   :  { %v6054_v53 = vpack.c.bf16 %v2197_v51, %v2197_v51 }
 0xbe1   :  { %5298 = vmatmul.mubr.msk.bf16.vlgmr.msra.gmra.mxu1 %vm2021_vm3, %v6054_v53  ;;  %5310 = vmatmul.mubr.msk.bf16.vlgmr.msra.gmra.mxu0 %vm2021_vm3, %v6054_v53 }
 0xbe2   :  { %5326 = vmatpush3.bf16.msra.mxu0 %v5753_v52  ;;  %5333 = vmatprep.mubr.msk.bf16.mxu0 %vm5824_vm0, %v5823_v36 }
 0xbe3   :  { %5327 = vmatprep.subr.bf16.mxu0 %v5823_v36  ;;  %5315 = vmatprep.mubr.msk.bf16.mxu1 %vm5824_vm0, %v5823_v36 }
 0xbe6   :  { %5328 = vmatpush3.bf16.msra.mxu0 %v5754_v54 }
 0xbe7   :  { %5329 = vmatprep.subr.bf16.mxu0 %v5823_v36 }
 0xbea   :  { %5330 = vmatpush3.bf16.msra.mxu0 %v5755_v55 }
 0xbeb   :  { %5331 = vmatprep.subr.bf16.mxu0 %v5823_v36 }
 0xbee   :  { %5332 = vmatpush3.bf16.msra.mxu0 %v5756_v56 }
 0xbef   :  { %5355 = vmatprep.subr.bf16.mxu0 %v5823_v36 }
 0xbf1   :  { %5334 = vmatmul.mubr.msk.bf16.vlgmr.msra.gmra.mxu0 %vm2021_vm3, %v6054_v53 }
 0xbf2   :  { %5357 = vmatprep.mubr.msk.bf16.mxu0 %vm5824_vm0, %v5823_v36 }
 0xca1   :  { %v2268_v57 = vpop.f32.mrf.mxu1  ;;  %v2343_v58 = vpop.f32.mrf.mxu0 }
 0xca2   :  { %v2351_v59 = vpack.c.bf16 %v2343_v58, %v2343_v58  ;;  %v2275_v61 = vpack.c.bf16 %v2268_v57, %v2268_v57  ;;  %v4781_v58 = vld [vmem:[%s6446_s5 + $0x10] sm:$0xf] }
 0xca3   :  { %v5299_v60 = vpop.f32.mrf.mxu1  ;;  %v5311_v34 = vpop.f32.mrf.mxu0 }
 0xca4   :  { %v2357_v62 = vsel %vm2355_vm5, %v2351_v59, 0  ;;  %v2403_v4 = vsel %vm2355_vm5, %v2275_v61, 0  ;;  %v5765_v59 = vld [vmem:[%s6447_s6 + $0xb8] sm:$0xff]   ;;  %v5766_v34 = vld [vmem:[%s6447_s6 + $0xb0] sm:$0xff]   ;;  %v5767_v61 = vld [vmem:[%s6447_s6 + $0xa8] sm:$0xff]  }
 0xca5   :  { %v2271_v63 = vpop.f32.mrf.mxu1  ;;  %v2346_v0 = vpop.f32.mrf.mxu0  ;;  %5314 = vmatpush3.bf16.msra.mxu1 %v2357_v62  ;;  %v5768_v62 = vld [vmem:[%s6447_s6 + $0xa0] sm:$0xff]  }
 0xca6   :  { %5319 = vmatprep.subr.bf16.mxu1 %v5823_v36 }
 0xca7   :  { %v5300_v2 = vpop.f32.mrf.mxu1  ;;  %v5312_v3 = vpop.f32.mrf.mxu0 }
 0xca8   :  { %5316 = vmatmul.mubr.msk.bf16.vlgmr.msra.gmra.mxu1 %vm2025_vm4, %v4735_v1 }
 0xca9   :  { %5320 = vmatpush3.bf16.msra.mxu1 %v2403_v4  ;;  %5321 = vmatprep.mubr.msk.bf16.mxu1 %vm5824_vm0, %v5823_v36 }
 0xcaa   :  { %5337 = vmatprep.subr.bf16.mxu1 %v5823_v36 }
 0xcb0   :  { %5322 = vmatmul.mubr.msk.bf16.vlgmr.msra.gmra.mxu1 %vm2025_vm4, %v2274_v5 }
 0xcb1   :  { %v2512_v6 = vpop.f32.mrf.mxu0  ;;  %5339 = vmatprep.mubr.msk.bf16.mxu1 %vm5824_vm0, %v5823_v36 }
 0xcb2   :  { %v2520_v7 = vpack.c.bf16 %v2512_v6, %v2512_v6 }
 0xcb3   :  { %v5335_v8 = vpop.f32.mrf.mxu0 }
 0xcb4   :  { %v2525_v9 = vsel %vm2355_vm5, %v2520_v7, 0 }
 0xcb5   :  { %v2515_v10 = vpop.f32.mrf.mxu0  ;;  %5338 = vmatpush3.bf16.msra.mxu1 %v2525_v9  ;;  %v4796_v9 = vld [vmem:[%s6446_s5 + $0x14] sm:$0xf] }
 0xcb6   :  { %5343 = vmatprep.subr.bf16.mxu1 %v5823_v36  ;;  %v5769_v10 = vld [vmem:[%s6447_s6 + $0xd8] sm:$0xff]  }
 0xcb7   :  { %v5336_v12 = vpop.f32.mrf.mxu0 }
 0xcb8   :  { %5340 = vmatmul.mubr.msk.bf16.vlgmr.msra.gmra.mxu1 %vm2025_vm4, %v4751_v35  ;;  %v5771_v12 = vld [vmem:[%s6447_s6 + $0xc8] sm:$0xff]  }
 0xcb9   :  { %5344 = vmatpush3.bf16.msra.mxu1 %v5757_v11  ;;  %5351 = vmatprep.mubr.msk.bf16.mxu1 %vm5824_vm0, %v5823_v36  ;;  %v5770_v11 = vld [vmem:[%s6447_s6 + $0xd0] sm:$0xff]  }
 0xcba   :  { %5345 = vmatprep.subr.bf16.mxu1 %v5823_v36 }
 0xcbd   :  { %5346 = vmatpush3.bf16.msra.mxu1 %v5758_v13  ;;  %v5772_v13 = vld [vmem:[%s6447_s6 + $0xc0] sm:$0xff]  }
 0xcbe   :  { %5347 = vmatprep.subr.bf16.mxu1 %v5823_v36 }
 0xcc1   :  { %5348 = vmatpush3.bf16.msra.mxu1 %v5759_v14 }
 0xcc2   :  { %5349 = vmatprep.subr.bf16.mxu1 %v5823_v36 }
 0xcc5   :  { %5350 = vmatpush3.bf16.msra.mxu1 %v5760_v15 }
 0xcc6   :  { %5373 = vmatprep.subr.bf16.mxu1 %v5823_v36 }
 0xcc8   :  { %5352 = vmatmul.mubr.msk.bf16.vlgmr.msra.gmra.mxu1 %vm2021_vm3, %v6054_v53 }
 0xcc9   :  { %5375 = vmatprep.mubr.msk.bf16.mxu1 %vm5824_vm0, %v5823_v36 }
 0xd68   :  { %v2393_v16 = vpop.f32.mrf.mxu1 }
 0xd6a   :  { %v5317_v18 = vpop.f32.mrf.mxu1 }
 0xd6c   :  { %v2396_v20 = vpop.f32.mrf.mxu1 }
 0xd6e   :  { %v5318_v21 = vpop.f32.mrf.mxu1 }
 0xd70   :  { %v2439_v22 = vpop.f32.mrf.mxu1 }
 0xd71   :  { %v2440_v23 = vadd.f32 %v2439_v22, %v2393_v16 }
 0xd72   :  { %v5323_v24 = vpop.f32.mrf.mxu1 }
 0xd74   :  { %v2442_v25 = vpop.f32.mrf.mxu1 }
 0xd76   :  { %v5324_v26 = vpop.f32.mrf.mxu1 }
 0xd77   :  { %v4811_v26 = vld [vmem:[%s6446_s5 + $0x18] sm:$0xf] }
 0xd78   :  { %v2561_v27 = vpop.f32.mrf.mxu1 }
 0xd79   :  { %v2567_v28 = vadd.f32 %v2561_v27, %v2440_v23  ;;  %v5773_v27 = vld [vmem:[%s6447_s6 + $0xf8] sm:$0xff]  }
 0xd7a   :  { %v5341_v29 = vpop.f32.mrf.mxu1 }
 0xd7b   :  { %v5774_v29 = vld [vmem:[%s6447_s6 + $0xf0] sm:$0xff]  }
 0xd7c   :  { %v2564_v30 = vpop.f32.mrf.mxu1 }
 0xd7d   :  { %v5775_v30 = vld [vmem:[%s6447_s6 + $0xe8] sm:$0xff]  }
 0xd7e   :  { %v5342_v31 = vpop.f32.mrf.mxu1 }
 0xd7f   :  { %v5776_v31 = vld [vmem:[%s6447_s6 + $0xe0] sm:$0xff]  }
 0xd88   :  { %v2635_v32 = vpop.f32.mrf.mxu1 }
 0xd89   :  { %v2643_v33 = vpack.c.bf16 %v2635_v32, %v2635_v32 }
 0xd8a   :  { %v5353_v37 = vpop.f32.mrf.mxu1 }
 0xd8b   :  { %v2648_v38 = vsel %vm2355_vm5, %v2643_v33, 0 }
 0xd8c   :  { %v2638_v40 = vpop.f32.mrf.mxu1  ;;  %5356 = vmatpush3.bf16.msra.mxu0 %v2648_v38 }
 0xd8d   :  { %5361 = vmatprep.subr.bf16.mxu0 %v5823_v36 }
 0xd8e   :  { %v5354_v43 = vpop.f32.mrf.mxu1 }
 0xd8f   :  { %5358 = vmatmul.mubr.msk.bf16.vlgmr.msra.gmra.mxu0 %vm2025_vm4, %v4766_v41 }
 0xd90   :  { %5362 = vmatpush3.bf16.msra.mxu0 %v5761_v42  ;;  %5369 = vmatprep.mubr.msk.bf16.mxu0 %vm5824_vm0, %v5823_v36 }
 0xd91   :  { %5363 = vmatprep.subr.bf16.mxu0 %v5823_v36 }
 0xd94   :  { %5364 = vmatpush3.bf16.msra.mxu0 %v5762_v44 }
 0xd95   :  { %5365 = vmatprep.subr.bf16.mxu0 %v5823_v36 }
 0xd98   :  { %5366 = vmatpush3.bf16.msra.mxu0 %v5763_v45 }
 0xd99   :  { %5367 = vmatprep.subr.bf16.mxu0 %v5823_v36 }
 0xd9c   :  { %5368 = vmatpush3.bf16.msra.mxu0 %v5764_v46  ;;  %v4826_v46 = vld [vmem:[%s6446_s5 + $0x1c] sm:$0xf] }
 0xd9d   :  { %5391 = vmatprep.subr.bf16.mxu0 %v5823_v36 }
 0xd9f   :  { %5370 = vmatmul.mubr.msk.bf16.vlgmr.msra.gmra.mxu0 %vm2021_vm3, %v6054_v53 }
 0xda0   :  { %5393 = vmatprep.mubr.msk.bf16.mxu0 %vm5824_vm0, %v5823_v36 }
 0xe4f   :  { %v2684_v47 = vpop.f32.mrf.mxu0 }
 0xe50   :  { %v2690_v48 = vadd.f32 %v2684_v47, %v2567_v28  ;;  %v5777_v47 = vld [vmem:[%s6447_s6 + $0x118] sm:$0xff]  }
 0xe51   :  { %v5359_v49 = vpop.f32.mrf.mxu0 }
 0xe52   :  { %v5778_v49 = vld [vmem:[%s6447_s6 + $0x110] sm:$0xff]  }
 0xe53   :  { %v2687_v50 = vpop.f32.mrf.mxu0 }
 0xe54   :  { %v5779_v50 = vld [vmem:[%s6447_s6 + $0x108] sm:$0xff]  }
 0xe55   :  { %v5360_v51 = vpop.f32.mrf.mxu0 }
 0xe56   :  { %v5780_v51 = vld [vmem:[%s6447_s6 + $0x100] sm:$0xff]  }
 0xe5f   :  { %v2758_v52 = vpop.f32.mrf.mxu0 }
 0xe60   :  { %v2766_v54 = vpack.c.bf16 %v2758_v52, %v2758_v52 }
 0xe61   :  { %v5371_v55 = vpop.f32.mrf.mxu0 }
 0xe62   :  { %v2771_v56 = vsel %vm2355_vm5, %v2766_v54, 0 }
 0xe63   :  { %v2761_v57 = vpop.f32.mrf.mxu0  ;;  %5374 = vmatpush3.bf16.msra.mxu1 %v2771_v56 }
 0xe64   :  { %5379 = vmatprep.subr.bf16.mxu1 %v5823_v36 }
 0xe65   :  { %v5372_v60 = vpop.f32.mrf.mxu0 }
 0xe66   :  { %5376 = vmatmul.mubr.msk.bf16.vlgmr.msra.gmra.mxu1 %vm2025_vm4, %v4781_v58 }
 0xe67   :  { %5380 = vmatpush3.bf16.msra.mxu1 %v5765_v59  ;;  %5387 = vmatprep.mubr.msk.bf16.mxu1 %vm5824_vm0, %v5823_v36 }
 0xe68   :  { %5381 = vmatprep.subr.bf16.mxu1 %v5823_v36 }
 0xe6b   :  { %5382 = vmatpush3.bf16.msra.mxu1 %v5766_v34 }
 0xe6c   :  { %5383 = vmatprep.subr.bf16.mxu1 %v5823_v36 }
 0xe6f   :  { %5384 = vmatpush3.bf16.msra.mxu1 %v5767_v61 }
 0xe70   :  { %5385 = vmatprep.subr.bf16.mxu1 %v5823_v36 }
 0xe73   :  { %5386 = vmatpush3.bf16.msra.mxu1 %v5768_v62  ;;  %v4841_v62 = vld [vmem:[%s6446_s5 + $0x20] sm:$0xf]  ;;  %s5828_s5 = smov 2  }
 0xe74   :  { %5409 = vmatprep.subr.bf16.mxu1 %v5823_v36 }
 0xe76   :  { %5388 = vmatmul.mubr.msk.bf16.vlgmr.msra.gmra.mxu1 %vm2021_vm3, %v6054_v53 }
 0xe77   :  { %5411 = vmatprep.mubr.msk.bf16.mxu1 %vm5824_vm0, %v5823_v36 }
 0xf26   :  { %v2807_v63 = vpop.f32.mrf.mxu1 }
 0xf27   :  { %v2813_v0 = vadd.f32 %v2807_v63, %v2690_v48 }
 0xf28   :  { %v5377_v1 = vpop.f32.mrf.mxu1 }
 0xf2a   :  { %v2810_v2 = vpop.f32.mrf.mxu1 }
 0xf2c   :  { %v5378_v3 = vpop.f32.mrf.mxu1 }
 0xf36   :  { %v2881_v4 = vpop.f32.mrf.mxu1 }
 0xf37   :  { %v2889_v5 = vpack.c.bf16 %v2881_v4, %v2881_v4 }
 0xf38   :  { %v5389_v6 = vpop.f32.mrf.mxu1 }
 0xf39   :  { %v2894_v7 = vsel %vm2355_vm5, %v2889_v5, 0 }
 0xf3a   :  { %v2884_v8 = vpop.f32.mrf.mxu1  ;;  %5392 = vmatpush3.bf16.msra.mxu0 %v2894_v7 }
 0xf3b   :  { %5397 = vmatprep.subr.bf16.mxu0 %v5823_v36 }
 0xf3c   :  { %v5390_v35 = vpop.f32.mrf.mxu1 }
 0xf3d   :  { %5394 = vmatmul.mubr.msk.bf16.vlgmr.msra.gmra.mxu0 %vm2025_vm4, %v4796_v9 }
 0xf3e   :  { %5398 = vmatpush3.bf16.msra.mxu0 %v5769_v10  ;;  %5405 = vmatprep.mubr.msk.bf16.mxu0 %vm5824_vm0, %v5823_v36 }
 0xf3f   :  { %5399 = vmatprep.subr.bf16.mxu0 %v5823_v36 }
 0xf42   :  { %5400 = vmatpush3.bf16.msra.mxu0 %v5770_v11 }
 0xf43   :  { %5401 = vmatprep.subr.bf16.mxu0 %v5823_v36 }
 0xf46   :  { %5402 = vmatpush3.bf16.msra.mxu0 %v5771_v12 }
 0xf47   :  { %5403 = vmatprep.subr.bf16.mxu0 %v5823_v36 }
 0xf4a   :  { %5404 = vmatpush3.bf16.msra.mxu0 %v5772_v13 }
 0xf4b   :  { %5427 = vmatprep.subr.bf16.mxu0 %v5823_v36 }
 0xf4d   :  { %5406 = vmatmul.mubr.msk.bf16.vlgmr.msra.gmra.mxu0 %vm2021_vm3, %v6054_v53 }
 0xf4e   :  { %5429 = vmatprep.mubr.msk.bf16.mxu0 %vm5824_vm0, %v5823_v36 }
 0xffd   :  { %v2930_v14 = vpop.f32.mrf.mxu0 }
 0xffe   :  { %v2936_v15 = vadd.f32 %v2930_v14, %v2813_v0 }
 0xfff   :  { %v5395_v16 = vpop.f32.mrf.mxu0 }
0x1001   :  { %v2933_v18 = vpop.f32.mrf.mxu0 }
0x1002   :  { %v5827_v18 = vmov 2  }
0x1003   :  { %v5396_v20 = vpop.f32.mrf.mxu0  ;;  %5595 = vset.pattern.permute.xlu1 %v5827_v18 }
0x100d   :  { %v3004_v21 = vpop.f32.mrf.mxu0 }
0x100e   :  { %v3012_v22 = vpack.c.bf16 %v3004_v21, %v3004_v21 }
0x100f   :  { %v5407_v23 = vpop.f32.mrf.mxu0 }
0x1010   :  { %v3017_v24 = vsel %vm2355_vm5, %v3012_v22, 0  ;;  %v5782_v23 = vld [vmem:[%s6449_s8 + $0x8] sm:$0xff]  }
0x1011   :  { %v3007_v25 = vpop.f32.mrf.mxu0  ;;  %5410 = vmatpush3.bf16.msra.mxu1 %v3017_v24  ;;  %v5829_v24 = vmov 3  }
0x1012   :  { %5415 = vmatprep.subr.bf16.mxu1 %v5823_v36 }
0x1013   :  { %v5408_v28 = vpop.f32.mrf.mxu0 }
0x1014   :  { %5412 = vmatmul.mubr.msk.bf16.vlgmr.msra.gmra.mxu1 %vm2025_vm4, %v4811_v26 }
0x1015   :  { %5416 = vmatpush3.bf16.msra.mxu1 %v5773_v27  ;;  %5423 = vmatprep.mubr.msk.bf16.mxu1 %vm5824_vm0, %v5823_v36 }
0x1016   :  { %5417 = vmatprep.subr.bf16.mxu1 %v5823_v36 }
0x1019   :  { %5418 = vmatpush3.bf16.msra.mxu1 %v5774_v29 }
0x101a   :  { %5419 = vmatprep.subr.bf16.mxu1 %v5823_v36 }
0x101d   :  { %5420 = vmatpush3.bf16.msra.mxu1 %v5775_v30 }
0x101e   :  { %5421 = vmatprep.subr.bf16.mxu1 %v5823_v36 }
0x1021   :  { %5422 = vmatpush3.bf16.msra.mxu1 %v5776_v31 }
0x1022   :  { %5445 = vmatprep.subr.bf16.mxu1 %v5823_v36 }
0x1024   :  { %5424 = vmatmul.mubr.msk.bf16.vlgmr.msra.gmra.mxu1 %vm2021_vm3, %v6054_v53 }
0x1025   :  { %5447 = vmatprep.mubr.msk.bf16.mxu1 %vm5824_vm0, %v5823_v36 }
0x10d4   :  { %v3053_v32 = vpop.f32.mrf.mxu1 }
0x10d5   :  { %v3059_v33 = vadd.f32 %v3053_v32, %v2936_v15 }
0x10d6   :  { %v5413_v37 = vpop.f32.mrf.mxu1 }
0x10d8   :  { %v3056_v38 = vpop.f32.mrf.mxu1 }
0x10da   :  { %v5414_v40 = vpop.f32.mrf.mxu1 }
0x10e4   :  { %v3127_v41 = vpop.f32.mrf.mxu1 }
0x10e5   :  { %v3135_v42 = vpack.c.bf16 %v3127_v41, %v3127_v41 }
0x10e6   :  { %v5425_v43 = vpop.f32.mrf.mxu1 }
0x10e7   :  { %v3140_v44 = vsel %vm2355_vm5, %v3135_v42, 0  ;;  %v4851_v43 = vld [vmem:[%s6448_s7 + $0x4] sm:$0xf] }
0x10e8   :  { %v3130_v45 = vpop.f32.mrf.mxu1  ;;  %5428 = vmatpush3.bf16.msra.mxu0 %v3140_v44  ;;  %v3533_v44 = vld [vmem:[%s6448_s7] sm:$0xf] }
0x10e9   :  { %5433 = vmatprep.subr.bf16.mxu0 %v5823_v36  ;;  %v5783_v45 = vld [vmem:[%s6449_s8 + $0x10] sm:$0xff]  }
0x10ea   :  { %v5426_v48 = vpop.f32.mrf.mxu1 }
0x10eb   :  { %5430 = vmatmul.mubr.msk.bf16.vlgmr.msra.gmra.mxu0 %vm2025_vm4, %v4826_v46  ;;  %v5784_v48 = vld [vmem:[%s6449_s8 + $0x18] sm:$0xff]  }
0x10ec   :  { %5434 = vmatpush3.bf16.msra.mxu0 %v5777_v47  ;;  %5441 = vmatprep.mubr.msk.bf16.mxu0 %vm5824_vm0, %v5823_v36 }
0x10ed   :  { %5435 = vmatprep.subr.bf16.mxu0 %v5823_v36 }
0x10f0   :  { %5436 = vmatpush3.bf16.msra.mxu0 %v5778_v49  ;;  %v5785_v49 = vld [vmem:[%s6449_s8 + $0x20] sm:$0xff]  }
0x10f1   :  { %5437 = vmatprep.subr.bf16.mxu0 %v5823_v36 }
0x10f4   :  { %5438 = vmatpush3.bf16.msra.mxu0 %v5779_v50  ;;  %v5786_v50 = vld [vmem:[%s6449_s8 + $0x28] sm:$0xff]  }
0x10f5   :  { %5439 = vmatprep.subr.bf16.mxu0 %v5823_v36 }
0x10f8   :  { %5440 = vmatpush3.bf16.msra.mxu0 %v5780_v51  ;;  %v5787_v51 = vld [vmem:[%s6449_s8 + $0x30] sm:$0xff]  }
0x10f9   :  { %5456 = vmatprep.subr.mxu0 %v5823_v36 }
0x10fb   :  { %5442 = vmatmul.mubr.msk.bf16.vlgmr.msra.gmra.mxu0 %vm2021_vm3, %v6054_v53 }
0x10fc   :  { %5458 = vmatprep.mubr.msk.f32.mxu0 %vm5824_vm0, %v5823_v36 }
0x11ab   :  { %v3176_v52 = vpop.f32.mrf.mxu0 }
0x11ac   :  { %v3182_v54 = vadd.f32 %v3176_v52, %v3059_v33  ;;  %v5788_v52 = vld [vmem:[%s6449_s8 + $0x38] sm:$0xff]  }
0x11ad   :  { %v5431_v55 = vpop.f32.mrf.mxu0 }
0x11af   :  { %v3179_v56 = vpop.f32.mrf.mxu0 }
0x11b1   :  { %v5432_v57 = vpop.f32.mrf.mxu0 }
0x11bb   :  { %v3250_v58 = vpop.f32.mrf.mxu0 }
0x11bc   :  { %v3258_v59 = vpack.c.bf16 %v3250_v58, %v3250_v58 }
0x11bd   :  { %v5443_v60 = vpop.f32.mrf.mxu0 }
0x11be   :  { %v3263_v34 = vsel %vm2355_vm5, %v3258_v59, 0 }
0x11bf   :  { %v3253_v61 = vpop.f32.mrf.mxu0  ;;  %5446 = vmatpush3.bf16.msra.mxu1 %v3263_v34 }
0x11c0   :  { %5451 = vmatprep.subr.mxu1 %v5823_v36 }
0x11c1   :  { %v5444_v53 = vpop.f32.mrf.mxu0 }
0x11c2   :  { %5448 = vmatmul.mubr.msk.bf16.vlgmr.msra.gmra.mxu1 %vm2025_vm4, %v4841_v62 }
0x11c3   :  { %5453 = vmatprep.mubr.msk.f32.mxu1 %vm5824_vm0, %v5823_v36 }
0x1282   :  { %v3299_v63 = vpop.f32.mrf.mxu1 }
0x1283   :  { %v3305_v0 = vadd.f32 %v3299_v63, %v3182_v54  ;;  %v5789_v54 = vld [vmem:[%s6449_s8 + $0x40] sm:$0xff]  }
0x1284   :  { %v5449_v1 = vpop.f32.mrf.mxu1 }
0x1285   :  { %v3307_v2 = vsel %vm3306_vm6, %v3305_v0, 0.0 }
0x1286   :  { %3308 = vadd.xlane.f32.xlu1 %v3307_v2  ;;  %v3302_v3 = vpop.f32.mrf.mxu1 }
0x1287   :  { %v4858_v3 = vld [vmem:[%s6448_s7 + $0x8] sm:$0xf] }
0x1288   :  { %v5450_v4 = vpop.f32.mrf.mxu1 }
0x130f   :  { %v3309_v5 = vpop.xlane.xlu1 %3308 }
0x1310   :  { %5452 = vmatpush3.msra.mxu1 %v3309_v5 }
0x1311   :  { %5454 = vmatmul.mubr.msk.f32.vlgmr.msra.gmra.mxu1 %vm2025_vm4, %v5997_v17  ;;  %5461 = vmatprep.subr.bf16.mxu1 %v5823_v36 }
0x1312   :  { %5463 = vmatprep.mubr.msk.bf16.mxu1 %vm5824_vm0, %v5823_v36 }
0x13d1   :  { %v3376_v6 = vpop.f32.mrf.mxu1 }
0x13d2   :  { %v3380_v7 = vmul.f32 0.03125, %v3376_v6 }
0x13d3   :  { %v5455_v8 = vpop.f32.mrf.mxu1 }
0x13d4   :  { %3383 = vperm.xlu0 %5592, %v3380_v7  }
0x144f   :  { %v3384_v9 = vpop.permute.xlu0 %3383 }
0x1450   :  { %v3386_v10 = vsub.f32 %v3305_v0, %v3384_v9 }
0x1452   :  { %v3387_v35 = vmul.f32 %v3386_v10, %v3386_v10 }
0x1454   :  { %v3388_v11 = vsel %vm3306_vm6, %v3387_v35, 0.0 }
0x1455   :  { %3389 = vadd.xlane.f32.xlu0 %v3388_v11 }
0x14de   :  { %v3390_v12 = vpop.xlane.xlu0 %3389 }
0x14df   :  { %5457 = vmatpush3.msra.mxu0 %v3390_v12 }
0x14e0   :  { %5459 = vmatmul.mubr.msk.f32.vlgmr.msra.gmra.mxu0 %vm2025_vm4, %v5997_v17  ;;  %5467 = vmatprep.subr.bf16.mxu0 %v5823_v36  ;;  %v5781_v17 = vld [vmem:[%s6449_s8] sm:$0xff]  }
0x14e1   :  { %5469 = vmatprep.mubr.msk.bf16.mxu0 %vm5824_vm0, %v5823_v36  ;;  %5462 = vmatpush3.bf16.msra.mxu1 %v5781_v17 }
0x14e2   :  { %5468 = vmatpush3.bf16.msra.mxu0 %v5782_v23  ;;  %5473 = vmatprep.subr.bf16.mxu1 %v5823_v36 }
0x14e3   :  { %5479 = vmatprep.subr.bf16.mxu0 %v5823_v36 }
0x15a0   :  { %v3457_v13 = vpop.f32.mrf.mxu0 }
0x15a1   :  { %v3461_v14 = vmul.f32 0.03125, %v3457_v13 }
0x15a2   :  { %v5460_v15 = vpop.f32.mrf.mxu0 }
0x15a3   :  { %v3462_v16 = vadd.f32 1e-05, %v3461_v14 }
0x15a5   :  { %5792 = vrsqrt.f32 %v3462_v16  ;;  %v4870_v16 = vld [vmem:[%s6448_s7 + $0x10] sm:$0xf] }
0x15b2   :  { %v5793_v20 = vpop.eup %5792 }
0x15b3   :  { %3465 = vrot.lane.b32.xlu1 %v5793_v20, %s5828_s5 }
0x1625   :  { %v3466_v21 = vpop.permute.xlu1 %3465 }
0x1626   :  { %v3468_v22 = vmul.f32 %v3466_v21, %v6030_v39 }
0x1628   :  { %3471 = vperm.xlu1 %5595, %v3468_v22  }
0x162c   :  { %5596 = vset.pattern.permute.xlu1 %v5829_v24  ;;  %v4876_v24 = vld [vmem:[%s6448_s7 + $0x14] sm:$0xf] }
0x162d   :  { %3476 = vperm.xlu1 %5596, %v6030_v39  }
0x1631   :  { %5597 = vset.pattern.permute.xlu1 %v5825_v19 }
0x16a3   :  { %v3472_v25 = vpop.permute.xlu1 %3471 }
0x16a4   :  { %v3474_v26 = vmul.f32 %v3472_v25, %v3386_v10  ;;  %v4864_v10 = vld [vmem:[%s6448_s7 + $0xc] sm:$0xf] }
0x16a8   :  { %v3477_v27 = vpop.permute.xlu1 %3476 }
0x16a9   :  { %v3479_v28 = vadd.f32 %v3477_v27, %v3474_v26 }
0x16ab   :  { %v3480_v29 = vmax.f32 %v3479_v28, 0.0 }
0x16ad   :  { %v3481_v30 = vpack.c.bf16 %v3480_v29, %v3480_v29 }
0x16af   :  { %5464 = vmatmul.mubr.msk.bf16.vlgmr.msra.gmra.mxu1 %vm3306_vm6, %v3481_v30  ;;  %5470 = vmatmul.mubr.msk.bf16.vlgmr.msra.gmra.mxu0 %vm3306_vm6, %v3481_v30 }
0x16b0   :  { %5475 = vmatprep.mubr.msk.bf16.mxu1 %vm5824_vm0, %v5823_v36  ;;  %5481 = vmatprep.mubr.msk.bf16.mxu0 %vm5824_vm0, %v5823_v36 }
0x176f   :  { %v3527_v39 = vpop.f32.mrf.mxu1  ;;  %v3578_v31 = vpop.f32.mrf.mxu0 }
0x1770   :  { %v3534_v32 = vpack.c.bf16 %v3527_v39, %v3527_v39  ;;  %v3586_v19 = vpack.c.bf16 %v3578_v31, %v3578_v31  ;;  %v4882_v39 = vld [vmem:[%s6448_s7 + $0x18] sm:$0xf] }
0x1771   :  { %v5465_v33 = vpop.f32.mrf.mxu1  ;;  %v5471_v37 = vpop.f32.mrf.mxu0 }
0x1772   :  { %v3637_v38 = vsel %vm2355_vm5, %v3534_v32, 0  ;;  %v3591_v40 = vsel %vm2355_vm5, %v3586_v19, 0 }
0x1773   :  { %v3530_v41 = vpop.f32.mrf.mxu1  ;;  %v3581_v42 = vpop.f32.mrf.mxu0  ;;  %5474 = vmatpush3.bf16.msra.mxu1 %v3591_v40  ;;  %5480 = vmatpush3.bf16.msra.mxu0 %v3637_v38  ;;  %v4888_v40 = vld [vmem:[%s6448_s7 + $0x1c] sm:$0xf] }
0x1774   :  { %5485 = vmatprep.subr.bf16.mxu1 %v5823_v36  ;;  %5491 = vmatprep.subr.bf16.mxu0 %v5823_v36 }
0x1775   :  { %v5466_v46 = vpop.f32.mrf.mxu1  ;;  %v5472_v47 = vpop.f32.mrf.mxu0 }
0x1776   :  { %5476 = vmatmul.mubr.msk.bf16.vlgmr.msra.gmra.mxu1 %vm2025_vm4, %v4851_v43  ;;  %5482 = vmatmul.mubr.msk.bf16.vlgmr.msra.gmra.mxu0 %vm2025_vm4, %v3533_v44  ;;  %v4894_v47 = vld [vmem:[%s6448_s7 + $0x20] sm:$0xf] }
0x1777   :  { %5486 = vmatpush3.bf16.msra.mxu1 %v5783_v45  ;;  %5487 = vmatprep.mubr.msk.bf16.mxu1 %vm5824_vm0, %v5823_v36 }
0x1778   :  { %5497 = vmatprep.subr.bf16.mxu1 %v5823_v36  ;;  %5493 = vmatprep.mubr.msk.bf16.mxu0 %vm5824_vm0, %v5823_v36 }
0x177e   :  { %5488 = vmatmul.mubr.msk.bf16.vlgmr.msra.gmra.mxu1 %vm3306_vm6, %v3481_v30 }
0x177f   :  { %5498 = vmatpush3.bf16.msra.mxu1 %v5784_v48  ;;  %5499 = vmatprep.mubr.msk.bf16.mxu1 %vm5824_vm0, %v5823_v36 }
0x1780   :  { %5509 = vmatprep.subr.bf16.mxu1 %v5823_v36 }
0x1786   :  { %5500 = vmatmul.mubr.msk.bf16.vlgmr.msra.gmra.mxu1 %vm3306_vm6, %v3481_v30 }
0x1787   :  { %5510 = vmatpush3.bf16.msra.mxu1 %v5785_v49  ;;  %5511 = vmatprep.mubr.msk.bf16.mxu1 %vm5824_vm0, %v5823_v36 }
0x1788   :  { %5521 = vmatprep.subr.bf16.mxu1 %v5823_v36 }
0x178e   :  { %5512 = vmatmul.mubr.msk.bf16.vlgmr.msra.gmra.mxu1 %vm3306_vm6, %v3481_v30 }
0x178f   :  { %5522 = vmatpush3.bf16.msra.mxu1 %v5786_v50  ;;  %5523 = vmatprep.mubr.msk.bf16.mxu1 %vm5824_vm0, %v5823_v36 }
0x1790   :  { %5533 = vmatprep.subr.bf16.mxu1 %v5823_v36 }
0x1796   :  { %5524 = vmatmul.mubr.msk.bf16.vlgmr.msra.gmra.mxu1 %vm3306_vm6, %v3481_v30 }
0x1797   :  { %5534 = vmatpush3.bf16.msra.mxu1 %v5787_v51  ;;  %5535 = vmatprep.mubr.msk.bf16.mxu1 %vm5824_vm0, %v5823_v36 }
0x1798   :  { %5545 = vmatprep.subr.bf16.mxu1 %v5823_v36 }
0x179e   :  { %5536 = vmatmul.mubr.msk.bf16.vlgmr.msra.gmra.mxu1 %vm3306_vm6, %v3481_v30 }
0x179f   :  { %5546 = vmatpush3.bf16.msra.mxu1 %v5788_v52  ;;  %5547 = vmatprep.mubr.msk.bf16.mxu1 %vm5824_vm0, %v5823_v36 }
0x17a0   :  { %5557 = vmatprep.subr.bf16.mxu1 %v5823_v36 }
0x17a6   :  { %5548 = vmatmul.mubr.msk.bf16.vlgmr.msra.gmra.mxu1 %vm3306_vm6, %v3481_v30 }
0x17a7   :  { %5558 = vmatpush3.bf16.msra.mxu1 %v5789_v54  ;;  %5559 = vmatprep.mubr.msk.bf16.mxu1 %vm5824_vm0, %v5823_v36 }
0x17a8   :  { %5569 = vmatprep.subr.mxu1 %v5823_v36 }
0x17ae   :  { %5560 = vmatmul.mubr.msk.bf16.vlgmr.msra.gmra.mxu1 %vm3306_vm6, %v3481_v30 }
0x17af   :  { %5571 = vmatprep.mubr.msk.f32.mxu1 %vm5824_vm0, %v5823_v36 }
0x1836   :  { %v3627_v55 = vpop.f32.mrf.mxu1  ;;  %v3673_v56 = vpop.f32.mrf.mxu0 }
0x1837   :  { %v6367_v57 = vadd.f32 %v3673_v56, %v3627_v55 }
0x1838   :  { %v5477_v58 = vpop.f32.mrf.mxu1  ;;  %v5483_v59 = vpop.f32.mrf.mxu0 }
0x183a   :  { %v3630_v60 = vpop.f32.mrf.mxu1  ;;  %v3676_v34 = vpop.f32.mrf.mxu0 }
0x183c   :  { %v5478_v61 = vpop.f32.mrf.mxu1  ;;  %v5484_v62 = vpop.f32.mrf.mxu0 }
0x183e   :  { %v3722_v53 = vpop.f32.mrf.mxu1 }
0x183f   :  { %v3730_v63 = vpack.c.bf16 %v3722_v53, %v3722_v53 }
0x1840   :  { %v5489_v0 = vpop.f32.mrf.mxu1 }
0x1841   :  { %v3735_v1 = vsel %vm2355_vm5, %v3730_v63, 0 }
0x1842   :  { %v3725_v2 = vpop.f32.mrf.mxu1  ;;  %5492 = vmatpush3.bf16.msra.mxu0 %v3735_v1 }
0x1843   :  { %5503 = vmatprep.subr.bf16.mxu0 %v5823_v36 }
0x1844   :  { %v5490_v4 = vpop.f32.mrf.mxu1 }
0x1845   :  { %5494 = vmatmul.mubr.msk.bf16.vlgmr.msra.gmra.mxu0 %vm2025_vm4, %v4858_v3 }
0x1846   :  { %v3821_v5 = vpop.f32.mrf.mxu1  ;;  %5505 = vmatprep.mubr.msk.bf16.mxu0 %vm5824_vm0, %v5823_v36 }
0x1847   :  { %v3829_v6 = vpack.c.bf16 %v3821_v5, %v3821_v5 }
0x1848   :  { %v5501_v7 = vpop.f32.mrf.mxu1 }
0x1849   :  { %v3834_v8 = vsel %vm2355_vm5, %v3829_v6, 0 }
0x184a   :  { %v3824_v9 = vpop.f32.mrf.mxu1  ;;  %5504 = vmatpush3.bf16.msra.mxu0 %v3834_v8 }
0x184b   :  { %5515 = vmatprep.subr.bf16.mxu0 %v5823_v36 }
0x184c   :  { %v5502_v35 = vpop.f32.mrf.mxu1 }
0x184d   :  { %5506 = vmatmul.mubr.msk.bf16.vlgmr.msra.gmra.mxu0 %vm2025_vm4, %v4864_v10 }
0x184e   :  { %v3920_v11 = vpop.f32.mrf.mxu1  ;;  %5517 = vmatprep.mubr.msk.bf16.mxu0 %vm5824_vm0, %v5823_v36 }
0x184f   :  { %v3928_v12 = vpack.c.bf16 %v3920_v11, %v3920_v11 }
0x1850   :  { %v5513_v13 = vpop.f32.mrf.mxu1 }
0x1851   :  { %v3933_v14 = vsel %vm2355_vm5, %v3928_v12, 0 }
0x1852   :  { %v3923_v15 = vpop.f32.mrf.mxu1  ;;  %5516 = vmatpush3.bf16.msra.mxu0 %v3933_v14 }
0x1853   :  { %5527 = vmatprep.subr.bf16.mxu0 %v5823_v36 }
0x1854   :  { %v5514_v18 = vpop.f32.mrf.mxu1 }
0x1855   :  { %5518 = vmatmul.mubr.msk.bf16.vlgmr.msra.gmra.mxu0 %vm2025_vm4, %v4870_v16 }
0x1856   :  { %v4019_v20 = vpop.f32.mrf.mxu1  ;;  %5529 = vmatprep.mubr.msk.bf16.mxu0 %vm5824_vm0, %v5823_v36 }
0x1857   :  { %v4027_v21 = vpack.c.bf16 %v4019_v20, %v4019_v20 }
0x1858   :  { %v5525_v22 = vpop.f32.mrf.mxu1 }
0x1859   :  { %v4032_v17 = vsel %vm2355_vm5, %v4027_v21, 0  ;;  %v5796_v21 = vld [vmem:[%s6443_s2] sm:$0xff] }
0x185a   :  { %v4022_v23 = vpop.f32.mrf.mxu1  ;;  %5528 = vmatpush3.bf16.msra.mxu0 %v4032_v17 }
0x185b   :  { %5539 = vmatprep.subr.bf16.mxu0 %v5823_v36 }
0x185c   :  { %v5526_v25 = vpop.f32.mrf.mxu1 }
0x185d   :  { %5530 = vmatmul.mubr.msk.bf16.vlgmr.msra.gmra.mxu0 %vm2025_vm4, %v4876_v24 }
0x185e   :  { %v4118_v26 = vpop.f32.mrf.mxu1  ;;  %5541 = vmatprep.mubr.msk.bf16.mxu0 %vm5824_vm0, %v5823_v36 }
0x185f   :  { %v4126_v27 = vpack.c.bf16 %v4118_v26, %v4118_v26 }
0x1860   :  { %v5537_v28 = vpop.f32.mrf.mxu1 }
0x1861   :  { %v4131_v29 = vsel %vm2355_vm5, %v4126_v27, 0 }
0x1862   :  { %v4121_v30 = vpop.f32.mrf.mxu1  ;;  %5540 = vmatpush3.bf16.msra.mxu0 %v4131_v29 }
0x1863   :  { %5551 = vmatprep.subr.bf16.mxu0 %v5823_v36 }
0x1864   :  { %v5538_v31 = vpop.f32.mrf.mxu1 }
0x1865   :  { %5542 = vmatmul.mubr.msk.bf16.vlgmr.msra.gmra.mxu0 %vm2025_vm4, %v4882_v39 }
0x1866   :  { %v4217_v32 = vpop.f32.mrf.mxu1  ;;  %5553 = vmatprep.mubr.msk.bf16.mxu0 %vm5824_vm0, %v5823_v36 }
0x1867   :  { %v4225_v19 = vpack.c.bf16 %v4217_v32, %v4217_v32  ;;  %v5830_v32 = vmov 4  }
0x1868   :  { %v5549_v33 = vpop.f32.mrf.mxu1  ;;  %5598 = vset.pattern.permute.xlu0 %v5830_v32 }
0x1869   :  { %v4230_v37 = vsel %vm2355_vm5, %v4225_v19, 0  ;;  %v5831_v19 = vmov 5  }
0x186a   :  { %v4220_v38 = vpop.f32.mrf.mxu1  ;;  %5552 = vmatpush3.bf16.msra.mxu0 %v4230_v37  ;;  %v5797_v37 = vld [vmem:[%s6442_s1] sm:$0xff] }
0x186b   :  { %5563 = vmatprep.subr.bf16.mxu0 %v5823_v36 }
0x186c   :  { %v5550_v41 = vpop.f32.mrf.mxu1 }
0x186d   :  { %5554 = vmatmul.mubr.msk.bf16.vlgmr.msra.gmra.mxu0 %vm2025_vm4, %v4888_v40 }
0x186e   :  { %v4316_v42 = vpop.f32.mrf.mxu1  ;;  %5565 = vmatprep.mubr.msk.bf16.mxu0 %vm5824_vm0, %v5823_v36 }
0x186f   :  { %v4324_v43 = vpack.c.bf16 %v4316_v42, %v4316_v42 }
0x1870   :  { %v5561_v44 = vpop.f32.mrf.mxu1 }
0x1871   :  { %v4329_v45 = vsel %vm2355_vm5, %v4324_v43, 0 }
0x1872   :  { %v4319_v46 = vpop.f32.mrf.mxu1  ;;  %5564 = vmatpush3.bf16.msra.mxu0 %v4329_v45  ;;  %v5832_v45 = vmov 1.0  }
0x1873   :  { %5574 = vmatprep.subr.mxu0 %v5823_v36 }
0x1874   :  { %v5562_v48 = vpop.f32.mrf.mxu1 }
0x1875   :  { %5566 = vmatmul.mubr.msk.bf16.vlgmr.msra.gmra.mxu0 %vm2025_vm4, %v4894_v47 }
0x1876   :  { %5576 = vmatprep.mubr.msk.f32.mxu0 %vm5824_vm0, %v5823_v36 }
0x1905   :  { %v3771_v49 = vpop.f32.mrf.mxu0 }
0x1906   :  { %v3777_v36 = vadd.f32 %v3771_v49, %v6367_v57 }
0x1907   :  { %v5495_v50 = vpop.f32.mrf.mxu0 }
0x1909   :  { %v3774_v51 = vpop.f32.mrf.mxu0 }
0x190b   :  { %v5496_v52 = vpop.f32.mrf.mxu0 }
0x190d   :  { %v3870_v54 = vpop.f32.mrf.mxu0 }
0x190e   :  { %v3876_v5 = vadd.f32 %v3870_v54, %v3777_v36 }
0x190f   :  { %v5507_v55 = vpop.f32.mrf.mxu0 }
0x1911   :  { %v3873_v56 = vpop.f32.mrf.mxu0 }
0x1913   :  { %v5508_v58 = vpop.f32.mrf.mxu0 }
0x1915   :  { %v3969_v59 = vpop.f32.mrf.mxu0 }
0x1916   :  { %v3975_v7 = vadd.f32 %v3969_v59, %v3876_v5 }
0x1917   :  { %v5519_v60 = vpop.f32.mrf.mxu0 }
0x1919   :  { %v3972_v34 = vpop.f32.mrf.mxu0 }
0x191b   :  { %v5520_v61 = vpop.f32.mrf.mxu0 }
0x191d   :  { %v4068_v62 = vpop.f32.mrf.mxu0 }
0x191e   :  { %v4074_v9 = vadd.f32 %v4068_v62, %v3975_v7 }
0x191f   :  { %v5531_v53 = vpop.f32.mrf.mxu0 }
0x1921   :  { %v4071_v63 = vpop.f32.mrf.mxu0 }
0x1923   :  { %v5532_v0 = vpop.f32.mrf.mxu0 }
0x1925   :  { %v4167_v1 = vpop.f32.mrf.mxu0 }
0x1926   :  { %v4173_v35 = vadd.f32 %v4167_v1, %v4074_v9 }
0x1927   :  { %v5543_v2 = vpop.f32.mrf.mxu0 }
0x1929   :  { %v4170_v3 = vpop.f32.mrf.mxu0 }
0x192b   :  { %v5544_v4 = vpop.f32.mrf.mxu0 }
0x192d   :  { %v4266_v6 = vpop.f32.mrf.mxu0 }
0x192e   :  { %v4272_v12 = vadd.f32 %v4266_v6, %v4173_v35 }
0x192f   :  { %v5555_v8 = vpop.f32.mrf.mxu0 }
0x1931   :  { %v4269_v10 = vpop.f32.mrf.mxu0 }
0x1933   :  { %v5556_v11 = vpop.f32.mrf.mxu0 }
0x1935   :  { %v4365_v13 = vpop.f32.mrf.mxu0 }
0x1936   :  { %v4371_v14 = vadd.f32 %v4365_v13, %v4272_v12 }
0x1937   :  { %v5567_v15 = vpop.f32.mrf.mxu0 }
0x1938   :  { %v4373_v16 = vsel %vm4372_vm7, %v4371_v14, 0.0 }
0x1939   :  { %4374 = vadd.xlane.f32.xlu0 %v4373_v16  ;;  %v4368_v18 = vpop.f32.mrf.mxu0 }
0x193b   :  { %v5568_v20 = vpop.f32.mrf.mxu0 }
0x19c2   :  { %v4375_v57 = vpop.xlane.xlu0 %4374 }
0x19c3   :  { %5570 = vmatpush3.msra.mxu1 %v4375_v57 }
0x19c4   :  { %5572 = vmatmul.mubr.msk.f32.vlgmr.msra.gmra.mxu1 %vm2025_vm4, %v5796_v21 }
0x1a84   :  { %v4442_v22 = vpop.f32.mrf.mxu1 }
0x1a85   :  { %v4446_v17 = vmul.f32 0.125, %v4442_v22 }
0x1a86   :  { %v5573_v23 = vpop.f32.mrf.mxu1 }
0x1a87   :  { %4449 = vperm.xlu1 %5597, %v4446_v17  }
0x1a8b   :  { %5599 = vset.pattern.permute.xlu1 %v5831_v19 }
0x1b02   :  { %v4450_v24 = vpop.permute.xlu1 %4449 }
0x1b03   :  { %v4452_v25 = vsub.f32 %v4371_v14, %v4450_v24 }
0x1b05   :  { %v4453_v26 = vmul.f32 %v4452_v25, %v4452_v25 }
0x1b07   :  { %v4454_v27 = vsel %vm4372_vm7, %v4453_v26, 0.0 }
0x1b08   :  { %4455 = vadd.xlane.f32.xlu0 %v4454_v27 }
0x1b91   :  { %v4456_v28 = vpop.xlane.xlu0 %4455 }
0x1b92   :  { %5575 = vmatpush3.msra.mxu0 %v4456_v28 }
0x1b93   :  { %5577 = vmatmul.mubr.msk.f32.vlgmr.msra.gmra.mxu0 %vm2025_vm4, %v5796_v21 }
0x1c53   :  { %v4523_v29 = vpop.f32.mrf.mxu0 }
0x1c54   :  { %v4527_v30 = vmul.f32 0.125, %v4523_v29 }
0x1c55   :  { %v5578_v39 = vpop.f32.mrf.mxu0 }
0x1c56   :  { %v4528_v31 = vadd.f32 1e-05, %v4527_v30 }
0x1c58   :  { %5794 = vrsqrt.f32 %v4528_v31 }
0x1c65   :  { %v5795_v33 = vpop.eup %5794 }
0x1c66   :  { %4531 = vrot.lane.b32.xlu1 %v5795_v33, %s5822_s13 }
0x1c6a   :  { %4542 = vperm.xlu1 %5599, %v5797_v37  }
0x1cd8   :  { %v4532_v38 = vpop.permute.xlu1 %4531 }
0x1cd9   :  { %v4534_v40 = vmul.f32 %v5797_v37, %v4532_v38 }
0x1cdb   :  { %4537 = vperm.xlu0 %5598, %v4534_v40  }
0x1cdf   :  { %5600 = vset.pattern.permute.xlu0 %v5831_v19 }
0x1ce5   :  { %v4543_v42 = vpop.permute.xlu1 %4542 }
0x1d56   :  { %v4538_v41 = vpop.permute.xlu0 %4537 }
0x1d57   :  { %v4540_v43 = vmul.f32 %v4538_v41, %v4452_v25 }
0x1d59   :  { %v4545_v44 = vadd.f32 %v4543_v42, %v4540_v43 }
0x1d5b   :  { %vm4546_vm8 = vcmp.lt.f32.partialorder %v4545_v44, 0.0 }
0x1d5c   :  { %v4547_v46 = vsel %vm4546_vm8, -1.0, %v5832_v45 }
0x1d5d   :  { %4548 = vst.msk [vmem:[%s6450_s9] sm:$0xff] %vm4372_vm7, %v4547_v46 }
0x1d5e   :  { %4553 = vsyncpa [#allocation3], 1 }

</bundles_post_ra>
